<compile_context>
chip_gen: v6e
topology: v6e:2x2x1
jax: 0.10.0
libtpu: 0.0.40
codegen_flags: <defaults>
</compile_context>

<pallas_src>
import jax
import jax.numpy as jnp
from jax.experimental import pallas as pl
from jax.experimental.pallas import tpu as pltpu

_MIB = 1 << 20


# ----------------------------------------------------------------------------
# Fused kernel: three_nn + three_interpolate + (split-weight concat) + MLP
# ----------------------------------------------------------------------------
def _make_fused_kernel(num_layers, has_interp, has_uf, mxu_dtype):
    """Builds the fused kernel body.

    Input-ref order:
      if has_interp: unknown_T (1,3,TN), known (1,m,3), known_feats (1,C2,m)
      else:          interp_col (1,C2,1)   (broadcast inside the kernel)
      if has_uf:     unknow_feats (1,C1,TN)
      layer 0:       w0a (C0,C2) [, w0b (C0,C1) if has_uf], scale0, shift0
      layers 1..L-1: w, scale, shift
    followed by out_ref (1, C_last, TN).
    """

    def kernel(*refs):
        idx = 0
        if has_interp:
            u_ref, k_ref, kf_ref = refs[0], refs[1], refs[2]
            idx = 3
        else:
            interp_ref = refs[0]
            idx = 1
        if has_uf:
            uf_ref = refs[idx]
            idx += 1
        param_refs = refs[idx:-1]
        out_ref = refs[-1]
        tn = out_ref.shape[2]

        if has_interp:
            u = u_ref[0]                       # (3, TN) f32, coord-major (lane-dense)
            k = k_ref[0]                       # (m, 3) f32
            f = kf_ref[0]                      # (C2, m) in mxu_dtype
            m = k.shape[0]

            # Squared distances, coordinate-wise on the VPU, laid out (m, TN):
            # known index on sublanes, unknown points on lanes.
            d2 = jnp.zeros((m, tn), jnp.float32)
            for c in range(3):
                diff = k[:, c:c + 1] - u[c:c + 1, :]       # (m,1)-(1,TN) -> (m,TN)
                d2 = d2 + diff * diff

            row = jax.lax.broadcasted_iota(jnp.int32, (m, tn), 0)
            big = jnp.float32(3e38)

            # 3-NN: only record the selected row index + weight per round
            # ((1, TN) each) so at most ~2 (m, TN) arrays stay live in the loop.
            d = d2
            sels, ws = [], []
            for _ in range(3):
                dmin = jnp.min(d, axis=0, keepdims=True)                    # (1, TN)
                # first occurrence on ties, like the CUDA op
                sel = jnp.min(jnp.where(d == dmin, row, m), axis=0,
                              keepdims=True)                                # (1, TN)
                ws.append(1.0 / (jnp.sqrt(dmin) + 1e-8))    # sqrt on 3*TN values only
                sels.append(sel)
                d = jnp.where(row == sel, big, d)           # boolean mask, no onehot

            # Normalize the three (1, TN) weight rows (cheap; avoids any (m, TN)
            # normalization pass) and scatter them into the one-hot weight matrix
            # in a single (m, TN) pass after the selection loop.
            rinv = 1.0 / (ws[0] + ws[1] + ws[2])
            w0n, w1n, w2n = ws[0] * rinv, ws[1] * rinv, ws[2] * rinv
            wmat = jnp.where(
                row == sels[0], w0n,
                jnp.where(row == sels[1], w1n,
                          jnp.where(row == sels[2], w2n, 0.0)))             # (m, TN)

            # (C2, m) @ (m, TN) on the MXU. Normalized weights are in [0, 1] so
            # the bf16 cast is well-conditioned.
            interp = jnp.dot(f, wmat.astype(mxu_dtype),
                             preferred_element_type=jnp.float32)            # (C2, TN)
        else:
            # known is None: broadcast the single known_feats column along N.
            interp = jnp.broadcast_to(interp_ref[0], (interp_ref.shape[1], tn))

        # ---------------- SharedMLP chain, all in VMEM ----------------
        p = 0
        w0a = param_refs[p][...]; p += 1
        if has_uf:
            w0b = param_refs[p][...]; p += 1
        scale = param_refs[p][...]; p += 1
        shift = param_refs[p][...]; p += 1
        # Split first-layer weight replaces the channel concat:
        #   w0 @ [interp; uf] == w0[:, :C2] @ interp + w0[:, C2:] @ uf
        y = jnp.dot(w0a, interp.astype(mxu_dtype),
                    preferred_element_type=jnp.float32)
        if has_uf:
            y = y + jnp.dot(w0b, uf_ref[0], preferred_element_type=jnp.float32)
        x = jnp.maximum(y * scale + shift, 0.0)

        for _ in range(1, num_layers):
            w = param_refs[p][...]; p += 1
            scale = param_refs[p][...]; p += 1
            shift = param_refs[p][...]; p += 1
            y = jnp.dot(w, x.astype(mxu_dtype), preferred_element_type=jnp.float32)
            x = jnp.maximum(y * scale + shift, 0.0)

        out_ref[0] = x

    return kernel


# ----------------------------------------------------------------------------
# VMEM-budget-aware tile sizing
# ----------------------------------------------------------------------------
def _per_column_bytes(m, c_max, has_interp, mxu_itemsize):
    """Rough VMEM bytes needed per lane column (per unit of the N tile)."""
    b = 0
    if has_interp:
        b += 3 * 4 * m              # ~3 live (m, TN) f32 temporaries in the 3-NN phase
        b += mxu_itemsize * m       # one-hot weight matrix fed to the interp matmul
        b += 2 * 3 * 4              # double-buffered (3, TN) transposed coords
    b += 4 * 4 * c_max              # MLP activations (~2 live (C, TN) f32 tiles)
    b += 2 * mxu_itemsize * c_max   # activation casts / streamed feature tile
    b += 2 * 4 * c_max              # double-buffered output tile
    return max(b, 1)


def _choose_tile_n(n, m, c_max, has_interp, mxu_itemsize,
                   budget_bytes=20 * _MIB, max_tile=2048):
    """Lane-dense N tile sized so the in-kernel working set stays inside a VMEM
    budget that is safe on v5e/v6e/v7x; TN shrinks as m grows."""
    if n <= 128:
        return n
    cap = budget_bytes // _per_column_bytes(m, c_max, has_interp, mxu_itemsize)
    tn = int(max(128, min(cap, max_tile, n)))
    tn -= tn % 128
    return max(tn, 128)


# ----------------------------------------------------------------------------
# Module wrapper with deterministic parameter initialization
# ----------------------------------------------------------------------------
class PointnetFPModulePallas:
    def __init__(self, mlp, key, *, mxu_bf16=True):
        self.mlp = list(mlp)
        self.mxu_bf16 = mxu_bf16
        self.mxu_dtype = jnp.bfloat16 if mxu_bf16 else jnp.float32
        self.layers = []
        eps = 1e-5
        for i in range(len(mlp) - 1):
            c_in, c_out = mlp[i], mlp[i + 1]
            key, kw, kg, kb = jax.random.split(key, 4)
            w = 0.1 * jax.random.normal(kw, (c_out, c_in), jnp.float32)
            gamma = 1.0 + 0.1 * jax.random.normal(kg, (c_out,), jnp.float32)
            beta = 0.1 * jax.random.normal(kb, (c_out,), jnp.float32)
            run_mean = jnp.zeros((c_out,), jnp.float32)
            run_var = jnp.ones((c_out,), jnp.float32)
            scale = gamma / jnp.sqrt(run_var + eps)          # folded eval-mode BN
            shift = beta - run_mean * scale
            self.layers.append(
                (w, scale.reshape(c_out, 1), shift.reshape(c_out, 1))
            )

    def __call__(self, unknown, known, unknow_feats, known_feats):
        B, n, _ = unknown.shape
        has_interp = known is not None
        has_uf = unknow_feats is not None
        num_layers = len(self.layers)
        mxu_dtype = self.mxu_dtype
        mxu_isz = jnp.dtype(mxu_dtype).itemsize

        m = known.shape[1] if has_interp else 0
        if has_interp:
            assert m >= 3, "three_nn needs at least 3 known points"
        C2 = known_feats.shape[1]
        C1 = unknow_feats.shape[1] if has_uf else 0
        c_max = max([C1 + C2] + [w.shape[0] for (w, _, _) in self.layers])

        tn = _choose_tile_n(n, m, c_max, has_interp, mxu_isz)
        n_pad = -(-n // tn) * tn
        # v7x shards "parallel" grid axes over its 2 TensorCores; make sure the
        # grid has at least two steps when the problem allows it.
        if B * (n_pad // tn) < 2 and tn >= 256:
            tn //= 2
            tn -= tn % 128
            n_pad = -(-n // tn) * tn

        if n_pad != n:
            pad = n_pad - n
            unknown = jnp.pad(unknown, ((0, 0), (0, pad), (0, 0)))
            if has_uf:
                unknow_feats = jnp.pad(unknow_feats, ((0, 0), (0, 0), (0, pad)))

        grid = (B, n_pad // tn)
        c_last = self.layers[-1][0].shape[0]
        layer_params_mxu = [(w.astype(mxu_dtype), s, sh)
                            for (w, s, sh) in self.layers]

        # Explicit scoped-VMEM limit: above every gen's default (16/32 MiB) but
        # capped at 48 MiB so it stays safe on v7x's 64 MiB physical VMEM.
        workset = _per_column_bytes(m, c_max, has_interp, mxu_isz) * tn
        if has_interp:
            workset += 2 * (m * 128 * 4 + C2 * m * mxu_isz)   # known (lane-padded) + feats
        workset += sum(int(w.size) * mxu_isz + 2 * int(s.size) * 4
                       for (w, s, _) in layer_params_mxu)
        vmem_limit = int(min(max(2 * workset, 32 * _MIB), 48 * _MIB))

        def build(single_buffer):
            inputs, in_specs = [], []
            if has_interp:
                u_t = jnp.transpose(unknown, (0, 2, 1))       # (B, 3, n_pad)
                inputs += [u_t, known, known_feats.astype(mxu_dtype)]
                in_specs += [
                    pl.BlockSpec((1, 3, tn), lambda b, j: (b, 0, j)),
                    pl.BlockSpec((1, m, 3), lambda b, j: (b, 0, 0)),
                    pl.BlockSpec((1, C2, m), lambda b, j: (b, 0, 0)),
                ]
            else:
                # known is None: PyTorch expands known_feats (B, C2, 1) along n.
                # Pass only the (B, C2, 1) column; broadcast happens in-kernel
                # (no HBM-materialized broadcast).
                inputs += [known_feats[..., :1].astype(jnp.float32)]
                in_specs += [pl.BlockSpec((1, C2, 1), lambda b, j: (b, 0, 0))]
            if has_uf:
                inputs += [unknow_feats.astype(mxu_dtype)]
                in_specs += [pl.BlockSpec((1, C1, tn), lambda b, j: (b, 0, j))]

            def const_spec(shape):
                # Grid-invariant params: single-buffer to halve their VMEM cost.
                if single_buffer:
                    return pl.BlockSpec(shape, lambda b, j: (0, 0),
                                        pipeline_mode=pl.Buffered(1))
                return pl.BlockSpec(shape, lambda b, j: (0, 0))

            w0, s0, sh0 = layer_params_mxu[0]
            c0 = w0.shape[0]
            if has_uf:
                w0a, w0b = w0[:, :C2], w0[:, C2:]
                inputs += [w0a, w0b, s0, sh0]
                in_specs += [const_spec(w0a.shape), const_spec(w0b.shape),
                             const_spec((c0, 1)), const_spec((c0, 1))]
            else:
                inputs += [w0, s0, sh0]
                in_specs += [const_spec(w0.shape), const_spec((c0, 1)),
                             const_spec((c0, 1))]
            for (w, s, sh) in layer_params_mxu[1:]:
                co = w.shape[0]
                inputs += [w, s, sh]
                in_specs += [const_spec(w.shape), const_spec((co, 1)),
                             const_spec((co, 1))]
            return inputs, in_specs

        kernel = _make_fused_kernel(num_layers, has_interp, has_uf, mxu_dtype)

        def run(single_buffer):
            inputs, in_specs = build(single_buffer)
            flops_per_col = sum(2 * w.shape[0] * w.shape[1]
                                for (w, _, _) in self.layers)
            if has_interp:
                flops_per_col += 2 * C2 * m + 9 * m
            cost = pl.CostEstimate(
                flops=int(B * n_pad * flops_per_col),
                transcendentals=int(3 * B * n_pad) if has_interp else 0,
                bytes_accessed=int(sum(int(a.size) * a.dtype.itemsize
                                       for a in inputs)
                                   + B * c_last * n_pad * 4),
            )
            fn = pl.pallas_call(
                kernel,
                out_shape=jax.ShapeDtypeStruct((B, c_last, n_pad), jnp.float32),
                grid=grid,
                in_specs=in_specs,
                out_specs=pl.BlockSpec((1, c_last, tn), lambda b, j: (b, 0, j)),
                compiler_params=pltpu.CompilerParams(
                    dimension_semantics=("parallel", "parallel"),
                    vmem_limit_bytes=vmem_limit),
                cost_estimate=cost,
            )
            return fn(*inputs)

        try:
            out = run(True)
        except Exception:
            # Fallback for JAX versions where pl.Buffered(1) is not accepted on a
            # BlockSpec; default double-buffering is still correct.
            out = run(False)

        if n_pad != n:
            out = out[:, :, :n]
        return out


# ----------------------------------------------------------------------------
# Pure-JAX reference for verification (mirrors the kernel's bf16 MXU casts)
# ----------------------------------------------------------------------------
def reference_forward(module, unknown, known, unknow_feats, known_feats):
    f32 = jnp.float32
    if module.mxu_bf16:
        q = lambda a: a.astype(jnp.bfloat16).astype(f32)
    else:
        q = lambda a: a

    if known is not None:
        diff = unknown[:, :, None, :] - known[:, None, :, :]     # (B, n, m, 3)
        dist = jnp.sqrt(jnp.sum(diff * diff, axis=-1))           # (B, n, m)
        negvals, idx = jax.lax.top_k(-dist, 3)                   # (B, n, 3)
        d3 = -negvals
        dr = 1.0 / (d3 + 1e-8)
        weight = dr * (1.0 / jnp.sum(dr, axis=2, keepdims=True)) # (B, n, 3)
        onehot = jax.nn.one_hot(idx, known.shape[1], dtype=f32)  # (B, n, 3, m)
        wmat = jnp.einsum("bnkm,bnk->bmn", onehot, weight)       # (B, m, n)
        interp = jnp.einsum("bcm,bmn->bcn", q(known_feats), q(wmat))
    else:
        interp = jnp.broadcast_to(
            known_feats[..., :1],
            (known_feats.shape[0], known_feats.shape[1], unknown.shape[1]))
    x = interp
    if unknow_feats is not None:
        x = jnp.concatenate([interp, unknow_feats], axis=1)
    for w, scale, shift in module.layers:
        y = jnp.einsum("oc,bcn->bon", q(w), q(x))
        y = y * scale[None, :, :] + shift[None, :, :]
        x = jnp.maximum(y, 0.0)
    return x


if __name__ == "__main__":
    B, n, m = 2, 16, 8
    C1, C2 = 4, 6
    mlp = [C1 + C2, 16, 32]

    key = jax.random.PRNGKey(0)
    k1, k2, k3, k4, kp = jax.random.split(key, 5)
    unknown = jax.random.uniform(k1, (B, n, 3), jnp.float32)       # (B, n, 3)
    known = jax.random.uniform(k2, (B, m, 3), jnp.float32)         # (B, m, 3)
    unknow_feats = jax.random.normal(k3, (B, C1, n), jnp.float32)  # (B, C1, n)
    known_feats = jax.random.normal(k4, (B, C2, m), jnp.float32)   # (B, C2, m)

    module = PointnetFPModulePallas(mlp, kp)

    out = module(unknown, known, unknow_feats, known_feats)
    out = jax.block_until_ready(out)
    assert out.shape == (B, mlp[-1], n), out.shape

    ref = reference_forward(module, unknown, known, unknow_feats, known_feats)
    ref = jax.block_until_ready(ref)

    if jnp.allclose(out, ref, rtol=1e-3, atol=1e-3):
        print("KERNEL_OK")
    else:
        err = float(jnp.max(jnp.abs(out - ref)))
        raise SystemExit(f"mismatch: max abs err = {err}")
</pallas_src>

<mosaic_0001>
module attributes {stable_mosaic.version = 11 : i64} {
  func.func @kernel(%arg0: i32, %arg1: i32, %arg2: memref<1x3x16xf32, #tpu.memory_space<vmem>>, %arg3: memref<1x8x3xf32, #tpu.memory_space<vmem>>, %arg4: memref<1x6x8xbf16, #tpu.memory_space<vmem>>, %arg5: memref<1x4x16xbf16, #tpu.memory_space<vmem>>, %arg6: memref<16x6xbf16, #tpu.memory_space<vmem>>, %arg7: memref<16x4xbf16, #tpu.memory_space<vmem>>, %arg8: memref<16x1xf32, #tpu.memory_space<vmem>>, %arg9: memref<16x1xf32, #tpu.memory_space<vmem>>, %arg10: memref<32x16xbf16, #tpu.memory_space<vmem>>, %arg11: memref<32x1xf32, #tpu.memory_space<vmem>>, %arg12: memref<32x1xf32, #tpu.memory_space<vmem>>, %arg13: memref<1x32x16xf32, #tpu.memory_space<vmem>>) attributes {dimension_semantics = [#tpu.dimension_semantics<parallel>, #tpu.dimension_semantics<parallel>], iteration_bounds = array<i64: 2, 1>, scalar_prefetch = 0 : i64, scratch_operands = 0 : i64, tpu.core_type = #tpu.core_type<tc>, window_params = [{transform_indices = @transform_0, window_bounds = array<i64: 1, 3, 16>}, {transform_indices = @transform_1, window_bounds = array<i64: 1, 8, 3>}, {transform_indices = @transform_2, window_bounds = array<i64: 1, 6, 8>}, {transform_indices = @transform_3, window_bounds = array<i64: 1, 4, 16>}, {pipeline_mode = #tpu.pipeline_mode<synchronous>, transform_indices = @transform_4, window_bounds = array<i64: 16, 6>}, {pipeline_mode = #tpu.pipeline_mode<synchronous>, transform_indices = @transform_5, window_bounds = array<i64: 16, 4>}, {pipeline_mode = #tpu.pipeline_mode<synchronous>, transform_indices = @transform_6, window_bounds = array<i64: 16, 1>}, {pipeline_mode = #tpu.pipeline_mode<synchronous>, transform_indices = @transform_7, window_bounds = array<i64: 16, 1>}, {pipeline_mode = #tpu.pipeline_mode<synchronous>, transform_indices = @transform_8, window_bounds = array<i64: 32, 16>}, {pipeline_mode = #tpu.pipeline_mode<synchronous>, transform_indices = @transform_9, window_bounds = array<i64: 32, 1>}, {pipeline_mode = #tpu.pipeline_mode<synchronous>, transform_indices = @transform_10, window_bounds = array<i64: 32, 1>}, {transform_indices = @transform_11, window_bounds = array<i64: 1, 32, 16>}]} {
    %c0 = arith.constant 0 : index
    %c0_0 = arith.constant 0 : index
    %c0_1 = arith.constant 0 : index
    %0 = vector.load %arg2[%c0, %c0_0, %c0_1] : memref<1x3x16xf32, #tpu.memory_space<vmem>>, vector<1x3x16xf32>
    %1 = vector.shape_cast %0 : vector<1x3x16xf32> to vector<3x16xf32>
    %c0_2 = arith.constant 0 : index
    %c0_3 = arith.constant 0 : index
    %c0_4 = arith.constant 0 : index
    %2 = vector.load %arg3[%c0_2, %c0_3, %c0_4] : memref<1x8x3xf32, #tpu.memory_space<vmem>>, vector<1x8x3xf32>
    %3 = vector.shape_cast %2 : vector<1x8x3xf32> to vector<8x3xf32>
    %c0_5 = arith.constant 0 : index
    %c0_6 = arith.constant 0 : index
    %c0_7 = arith.constant 0 : index
    %4 = vector.load %arg4[%c0_5, %c0_6, %c0_7] : memref<1x6x8xbf16, #tpu.memory_space<vmem>>, vector<1x6x8xbf16>
    %5 = vector.shape_cast %4 : vector<1x6x8xbf16> to vector<6x8xbf16>
    %cst = arith.constant 0.000000e+00 : f32
    %6 = vector.broadcast %cst : f32 to vector<8x16xf32>
    %7 = vector.extract_strided_slice %3 {offsets = [0, 0], sizes = [8, 1], strides = [1, 1]} : vector<8x3xf32> to vector<8x1xf32>
    %8 = vector.extract_strided_slice %1 {offsets = [0, 0], sizes = [1, 16], strides = [1, 1]} : vector<3x16xf32> to vector<1x16xf32>
    %9 = vector.broadcast %7 : vector<8x1xf32> to vector<8x16xf32>
    %10 = vector.broadcast %8 : vector<1x16xf32> to vector<8x16xf32>
    %11 = arith.subf %9, %10 : vector<8x16xf32>
    %12 = arith.mulf %11, %11 : vector<8x16xf32>
    %13 = arith.addf %6, %12 : vector<8x16xf32>
    %14 = vector.extract_strided_slice %3 {offsets = [0, 1], sizes = [8, 1], strides = [1, 1]} : vector<8x3xf32> to vector<8x1xf32>
    %15 = vector.extract_strided_slice %1 {offsets = [1, 0], sizes = [1, 16], strides = [1, 1]} : vector<3x16xf32> to vector<1x16xf32>
    %16 = vector.broadcast %14 : vector<8x1xf32> to vector<8x16xf32>
    %17 = vector.broadcast %15 : vector<1x16xf32> to vector<8x16xf32>
    %18 = arith.subf %16, %17 : vector<8x16xf32>
    %19 = arith.mulf %18, %18 : vector<8x16xf32>
    %20 = arith.addf %13, %19 : vector<8x16xf32>
    %21 = vector.extract_strided_slice %3 {offsets = [0, 2], sizes = [8, 1], strides = [1, 1]} : vector<8x3xf32> to vector<8x1xf32>
    %22 = vector.extract_strided_slice %1 {offsets = [2, 0], sizes = [1, 16], strides = [1, 1]} : vector<3x16xf32> to vector<1x16xf32>
    %23 = vector.broadcast %21 : vector<8x1xf32> to vector<8x16xf32>
    %24 = vector.broadcast %22 : vector<1x16xf32> to vector<8x16xf32>
    %25 = arith.subf %23, %24 : vector<8x16xf32>
    %26 = arith.mulf %25, %25 : vector<8x16xf32>
    %27 = arith.addf %20, %26 : vector<8x16xf32>
    %28 = tpu.iota {dimensions = array<i32: 0>} : vector<8x16xi32>
    %cst_8 = arith.constant dense<0x7F800000> : vector<16xf32>
    %29 = vector.multi_reduction <minimumf>, %27, %cst_8 [0] : vector<8x16xf32> to vector<16xf32>
    %30 = vector.shape_cast %29 : vector<16xf32> to vector<1x16xf32>
    %31 = vector.broadcast %30 : vector<1x16xf32> to vector<8x16xf32>
    %32 = arith.cmpf oeq, %27, %31 : vector<8x16xf32>
    %c8_i32 = arith.constant 8 : i32
    %33 = vector.broadcast %c8_i32 : i32 to vector<8x16xi32>
    %34 = arith.select %32, %28, %33 : vector<8x16xi1>, vector<8x16xi32>
    %cst_9 = arith.constant dense<2147483647> : vector<16xi32>
    %35 = vector.multi_reduction <minsi>, %34, %cst_9 [0] : vector<8x16xi32> to vector<16xi32>
    %36 = vector.shape_cast %35 : vector<16xi32> to vector<1x16xi32>
    %37 = math.sqrt %30 : vector<1x16xf32>
    %cst_10 = arith.constant 9.99999993E-9 : f32
    %38 = vector.broadcast %cst_10 : f32 to vector<1x16xf32>
    %39 = arith.addf %37, %38 : vector<1x16xf32>
    %cst_11 = arith.constant 1.000000e+00 : f32
    %40 = vector.broadcast %cst_11 : f32 to vector<1x16xf32>
    %41 = arith.divf %40, %39 : vector<1x16xf32>
    %42 = vector.broadcast %36 : vector<1x16xi32> to vector<8x16xi32>
    %43 = arith.cmpi eq, %28, %42 : vector<8x16xi32>
    %cst_12 = arith.constant 3.000000e+38 : f32
    %44 = vector.broadcast %cst_12 : f32 to vector<8x16xf32>
    %45 = arith.select %43, %44, %27 : vector<8x16xi1>, vector<8x16xf32>
    %cst_13 = arith.constant dense<0x7F800000> : vector<16xf32>
    %46 = vector.multi_reduction <minimumf>, %45, %cst_13 [0] : vector<8x16xf32> to vector<16xf32>
    %47 = vector.shape_cast %46 : vector<16xf32> to vector<1x16xf32>
    %48 = vector.broadcast %47 : vector<1x16xf32> to vector<8x16xf32>
    %49 = arith.cmpf oeq, %45, %48 : vector<8x16xf32>
    %c8_i32_14 = arith.constant 8 : i32
    %50 = vector.broadcast %c8_i32_14 : i32 to vector<8x16xi32>
    %51 = arith.select %49, %28, %50 : vector<8x16xi1>, vector<8x16xi32>
    %cst_15 = arith.constant dense<2147483647> : vector<16xi32>
    %52 = vector.multi_reduction <minsi>, %51, %cst_15 [0] : vector<8x16xi32> to vector<16xi32>
    %53 = vector.shape_cast %52 : vector<16xi32> to vector<1x16xi32>
    %54 = math.sqrt %47 : vector<1x16xf32>
    %cst_16 = arith.constant 9.99999993E-9 : f32
    %55 = vector.broadcast %cst_16 : f32 to vector<1x16xf32>
    %56 = arith.addf %54, %55 : vector<1x16xf32>
    %cst_17 = arith.constant 1.000000e+00 : f32
    %57 = vector.broadcast %cst_17 : f32 to vector<1x16xf32>
    %58 = arith.divf %57, %56 : vector<1x16xf32>
    %59 = vector.broadcast %53 : vector<1x16xi32> to vector<8x16xi32>
    %60 = arith.cmpi eq, %28, %59 : vector<8x16xi32>
    %cst_18 = arith.constant 3.000000e+38 : f32
    %61 = vector.broadcast %cst_18 : f32 to vector<8x16xf32>
    %62 = arith.select %60, %61, %45 : vector<8x16xi1>, vector<8x16xf32>
    %cst_19 = arith.constant dense<0x7F800000> : vector<16xf32>
    %63 = vector.multi_reduction <minimumf>, %62, %cst_19 [0] : vector<8x16xf32> to vector<16xf32>
    %64 = vector.shape_cast %63 : vector<16xf32> to vector<1x16xf32>
    %65 = vector.broadcast %64 : vector<1x16xf32> to vector<8x16xf32>
    %66 = arith.cmpf oeq, %62, %65 : vector<8x16xf32>
    %c8_i32_20 = arith.constant 8 : i32
    %67 = vector.broadcast %c8_i32_20 : i32 to vector<8x16xi32>
    %68 = arith.select %66, %28, %67 : vector<8x16xi1>, vector<8x16xi32>
    %cst_21 = arith.constant dense<2147483647> : vector<16xi32>
    %69 = vector.multi_reduction <minsi>, %68, %cst_21 [0] : vector<8x16xi32> to vector<16xi32>
    %70 = vector.shape_cast %69 : vector<16xi32> to vector<1x16xi32>
    %71 = math.sqrt %64 : vector<1x16xf32>
    %cst_22 = arith.constant 9.99999993E-9 : f32
    %72 = vector.broadcast %cst_22 : f32 to vector<1x16xf32>
    %73 = arith.addf %71, %72 : vector<1x16xf32>
    %cst_23 = arith.constant 1.000000e+00 : f32
    %74 = vector.broadcast %cst_23 : f32 to vector<1x16xf32>
    %75 = arith.divf %74, %73 : vector<1x16xf32>
    %76 = arith.addf %41, %58 : vector<1x16xf32>
    %77 = arith.addf %76, %75 : vector<1x16xf32>
    %cst_24 = arith.constant 1.000000e+00 : f32
    %78 = vector.broadcast %cst_24 : f32 to vector<1x16xf32>
    %79 = arith.divf %78, %77 : vector<1x16xf32>
    %80 = arith.mulf %41, %79 : vector<1x16xf32>
    %81 = arith.mulf %58, %79 : vector<1x16xf32>
    %82 = arith.mulf %75, %79 : vector<1x16xf32>
    %83 = vector.broadcast %36 : vector<1x16xi32> to vector<8x16xi32>
    %84 = arith.cmpi eq, %28, %83 : vector<8x16xi32>
    %85 = vector.broadcast %53 : vector<1x16xi32> to vector<8x16xi32>
    %86 = arith.cmpi eq, %28, %85 : vector<8x16xi32>
    %87 = vector.broadcast %70 : vector<1x16xi32> to vector<8x16xi32>
    %88 = arith.cmpi eq, %28, %87 : vector<8x16xi32>
    %cst_25 = arith.constant 0.000000e+00 : f32
    %89 = vector.shape_cast %82 : vector<1x16xf32> to vector<1x16xf32>
    %90 = vector.broadcast %89 : vector<1x16xf32> to vector<8x16xf32>
    %91 = vector.broadcast %cst_25 : f32 to vector<8x16xf32>
    %92 = arith.select %88, %90, %91 : vector<8x16xi1>, vector<8x16xf32>
    %93 = vector.shape_cast %81 : vector<1x16xf32> to vector<1x16xf32>
    %94 = vector.broadcast %93 : vector<1x16xf32> to vector<8x16xf32>
    %95 = arith.select %86, %94, %92 : vector<8x16xi1>, vector<8x16xf32>
    %96 = vector.shape_cast %80 : vector<1x16xf32> to vector<1x16xf32>
    %97 = vector.broadcast %96 : vector<1x16xf32> to vector<8x16xf32>
    %98 = arith.select %84, %97, %95 : vector<8x16xi1>, vector<8x16xf32>
    %99 = arith.truncf %98 : vector<8x16xf32> to vector<8x16xbf16>
    %cst_26 = arith.constant dense<0.000000e+00> : vector<6x16xf32>
    %100 = tpu.matmul %5, %99, %cst_26 {dimension_numbers = #tpu.dot_dimension_numbers<[1], [0], [0], [1], [0, 0, 1, 1], [], []>} : vector<6x8xbf16>, vector<8x16xbf16>, vector<6x16xf32> -> vector<6x16xf32>
    %c0_27 = arith.constant 0 : index
    %c0_28 = arith.constant 0 : index
    %101 = vector.load %arg6[%c0_27, %c0_28] : memref<16x6xbf16, #tpu.memory_space<vmem>>, vector<16x6xbf16>
    %c0_29 = arith.constant 0 : index
    %c0_30 = arith.constant 0 : index
    %102 = vector.load %arg7[%c0_29, %c0_30] : memref<16x4xbf16, #tpu.memory_space<vmem>>, vector<16x4xbf16>
    %c0_31 = arith.constant 0 : index
    %c0_32 = arith.constant 0 : index
    %103 = vector.load %arg8[%c0_31, %c0_32] : memref<16x1xf32, #tpu.memory_space<vmem>>, vector<16x1xf32>
    %c0_33 = arith.constant 0 : index
    %c0_34 = arith.constant 0 : index
    %104 = vector.load %arg9[%c0_33, %c0_34] : memref<16x1xf32, #tpu.memory_space<vmem>>, vector<16x1xf32>
    %105 = arith.truncf %100 : vector<6x16xf32> to vector<6x16xbf16>
    %cst_35 = arith.constant dense<0.000000e+00> : vector<16x16xf32>
    %106 = tpu.matmul %101, %105, %cst_35 {dimension_numbers = #tpu.dot_dimension_numbers<[1], [0], [0], [1], [0, 0, 1, 1], [], []>} : vector<16x6xbf16>, vector<6x16xbf16>, vector<16x16xf32> -> vector<16x16xf32>
    %c0_36 = arith.constant 0 : index
    %c0_37 = arith.constant 0 : index
    %c0_38 = arith.constant 0 : index
    %107 = vector.load %arg5[%c0_36, %c0_37, %c0_38] : memref<1x4x16xbf16, #tpu.memory_space<vmem>>, vector<1x4x16xbf16>
    %108 = vector.shape_cast %107 : vector<1x4x16xbf16> to vector<4x16xbf16>
    %cst_39 = arith.constant dense<0.000000e+00> : vector<16x16xf32>
    %109 = tpu.matmul %102, %108, %cst_39 {dimension_numbers = #tpu.dot_dimension_numbers<[1], [0], [0], [1], [0, 0, 1, 1], [], []>} : vector<16x4xbf16>, vector<4x16xbf16>, vector<16x16xf32> -> vector<16x16xf32>
    %110 = arith.addf %106, %109 : vector<16x16xf32>
    %111 = vector.broadcast %103 : vector<16x1xf32> to vector<16x16xf32>
    %112 = arith.mulf %110, %111 : vector<16x16xf32>
    %113 = vector.broadcast %104 : vector<16x1xf32> to vector<16x16xf32>
    %114 = arith.addf %112, %113 : vector<16x16xf32>
    %cst_40 = arith.constant 0.000000e+00 : f32
    %115 = vector.broadcast %cst_40 : f32 to vector<16x16xf32>
    %116 = arith.maximumf %114, %115 : vector<16x16xf32>
    %c0_41 = arith.constant 0 : index
    %c0_42 = arith.constant 0 : index
    %117 = vector.load %arg10[%c0_41, %c0_42] : memref<32x16xbf16, #tpu.memory_space<vmem>>, vector<32x16xbf16>
    %c0_43 = arith.constant 0 : index
    %c0_44 = arith.constant 0 : index
    %118 = vector.load %arg11[%c0_43, %c0_44] : memref<32x1xf32, #tpu.memory_space<vmem>>, vector<32x1xf32>
    %c0_45 = arith.constant 0 : index
    %c0_46 = arith.constant 0 : index
    %119 = vector.load %arg12[%c0_45, %c0_46] : memref<32x1xf32, #tpu.memory_space<vmem>>, vector<32x1xf32>
    %120 = arith.truncf %116 : vector<16x16xf32> to vector<16x16xbf16>
    %cst_47 = arith.constant dense<0.000000e+00> : vector<32x16xf32>
    %121 = tpu.matmul %117, %120, %cst_47 {dimension_numbers = #tpu.dot_dimension_numbers<[1], [0], [0], [1], [0, 0, 1, 1], [], []>} : vector<32x16xbf16>, vector<16x16xbf16>, vector<32x16xf32> -> vector<32x16xf32>
    %122 = vector.broadcast %118 : vector<32x1xf32> to vector<32x16xf32>
    %123 = arith.mulf %121, %122 : vector<32x16xf32>
    %124 = vector.broadcast %119 : vector<32x1xf32> to vector<32x16xf32>
    %125 = arith.addf %123, %124 : vector<32x16xf32>
    %cst_48 = arith.constant 0.000000e+00 : f32
    %126 = vector.broadcast %cst_48 : f32 to vector<32x16xf32>
    %127 = arith.maximumf %125, %126 : vector<32x16xf32>
    %c0_49 = arith.constant 0 : index
    %c0_50 = arith.constant 0 : index
    %c0_51 = arith.constant 0 : index
    %128 = vector.load %arg13[%c0_49, %c0_50, %c0_51] : memref<1x32x16xf32, #tpu.memory_space<vmem>>, vector<1x32x16xf32>
    %129 = vector.shape_cast %128 : vector<1x32x16xf32> to vector<32x16xf32>
    %130 = vector.shape_cast %127 : vector<32x16xf32> to vector<1x32x16xf32>
    tpu.vector_store %arg13[%c0_49, %c0_50, %c0_51], %130 {strides = array<i32>} : memref<1x32x16xf32, #tpu.memory_space<vmem>>, vector<1x32x16xf32>,
    return
  }
  func.func @transform_0(%arg0: i32, %arg1: i32) -> (i32, i32, i32) {
    %c0_i32 = arith.constant 0 : i32
    %c0_i32_0 = arith.constant 0 : i32
    return %arg0, %c0_i32, %arg1 : i32, i32, i32
  }
  func.func @transform_1(%arg0: i32, %arg1: i32) -> (i32, i32, i32) {
    %c0_i32 = arith.constant 0 : i32
    %c0_i32_0 = arith.constant 0 : i32
    %c0_i32_1 = arith.constant 0 : i32
    return %arg0, %c0_i32, %c0_i32_0 : i32, i32, i32
  }
  func.func @transform_2(%arg0: i32, %arg1: i32) -> (i32, i32, i32) {
    %c0_i32 = arith.constant 0 : i32
    %c0_i32_0 = arith.constant 0 : i32
    %c0_i32_1 = arith.constant 0 : i32
    return %arg0, %c0_i32, %c0_i32_0 : i32, i32, i32
  }
  func.func @transform_3(%arg0: i32, %arg1: i32) -> (i32, i32, i32) {
    %c0_i32 = arith.constant 0 : i32
    %c0_i32_0 = arith.constant 0 : i32
    return %arg0, %c0_i32, %arg1 : i32, i32, i32
  }
  func.func @transform_4(%arg0: i32, %arg1: i32) -> (i32, i32) {
    %c0_i32 = arith.constant 0 : i32
    %c0_i32_0 = arith.constant 0 : i32
    %c0_i32_1 = arith.constant 0 : i32
    return %c0_i32, %c0_i32_0 : i32, i32
  }
  func.func @transform_5(%arg0: i32, %arg1: i32) -> (i32, i32) {
    %c0_i32 = arith.constant 0 : i32
    %c0_i32_0 = arith.constant 0 : i32
    %c0_i32_1 = arith.constant 0 : i32
    return %c0_i32, %c0_i32_0 : i32, i32
  }
  func.func @transform_6(%arg0: i32, %arg1: i32) -> (i32, i32) {
    %c0_i32 = arith.constant 0 : i32
    %c0_i32_0 = arith.constant 0 : i32
    %c0_i32_1 = arith.constant 0 : i32
    return %c0_i32, %c0_i32_0 : i32, i32
  }
  func.func @transform_7(%arg0: i32, %arg1: i32) -> (i32, i32) {
    %c0_i32 = arith.constant 0 : i32
    %c0_i32_0 = arith.constant 0 : i32
    %c0_i32_1 = arith.constant 0 : i32
    return %c0_i32, %c0_i32_0 : i32, i32
  }
  func.func @transform_8(%arg0: i32, %arg1: i32) -> (i32, i32) {
    %c0_i32 = arith.constant 0 : i32
    %c0_i32_0 = arith.constant 0 : i32
    %c0_i32_1 = arith.constant 0 : i32
    return %c0_i32, %c0_i32_0 : i32, i32
  }
  func.func @transform_9(%arg0: i32, %arg1: i32) -> (i32, i32) {
    %c0_i32 = arith.constant 0 : i32
    %c0_i32_0 = arith.constant 0 : i32
    %c0_i32_1 = arith.constant 0 : i32
    return %c0_i32, %c0_i32_0 : i32, i32
  }
  func.func @transform_10(%arg0: i32, %arg1: i32) -> (i32, i32) {
    %c0_i32 = arith.constant 0 : i32
    %c0_i32_0 = arith.constant 0 : i32
    %c0_i32_1 = arith.constant 0 : i32
    return %c0_i32, %c0_i32_0 : i32, i32
  }
  func.func @transform_11(%arg0: i32, %arg1: i32) -> (i32, i32, i32) {
    %c0_i32 = arith.constant 0 : i32
    %c0_i32_0 = arith.constant 0 : i32
    return %arg0, %c0_i32, %arg1 : i32, i32, i32
  }
}

module attributes {stable_mosaic.version = 11 : i64} {
  func.func @kernel(%arg0: i32, %arg1: i32, %arg2: memref<1x3x16xf32, #tpu.memory_space<vmem>>, %arg3: memref<1x8x3xf32, #tpu.memory_space<vmem>>, %arg4: memref<1x6x8xbf16, #tpu.memory_space<vmem>>, %arg5: memref<1x4x16xbf16, #tpu.memory_space<vmem>>, %arg6: memref<16x6xbf16, #tpu.memory_space<vmem>>, %arg7: memref<16x4xbf16, #tpu.memory_space<vmem>>, %arg8: memref<16x1xf32, #tpu.memory_space<vmem>>, %arg9: memref<16x1xf32, #tpu.memory_space<vmem>>, %arg10: memref<32x16xbf16, #tpu.memory_space<vmem>>, %arg11: memref<32x1xf32, #tpu.memory_space<vmem>>, %arg12: memref<32x1xf32, #tpu.memory_space<vmem>>, %arg13: memref<1x32x16xf32, #tpu.memory_space<vmem>>) attributes {dimension_semantics = [#tpu.dimension_semantics<parallel>, #tpu.dimension_semantics<parallel>], iteration_bounds = array<i64: 2, 1>, scalar_prefetch = 0 : i64, scratch_operands = 0 : i64, tpu.core_type = #tpu.core_type<tc>, window_params = [{transform_indices = @transform_0, window_bounds = array<i64: 1, 3, 16>}, {transform_indices = @transform_1, window_bounds = array<i64: 1, 8, 3>}, {transform_indices = @transform_2, window_bounds = array<i64: 1, 6, 8>}, {transform_indices = @transform_3, window_bounds = array<i64: 1, 4, 16>}, {pipeline_mode = #tpu.pipeline_mode<synchronous>, transform_indices = @transform_4, window_bounds = array<i64: 16, 6>}, {pipeline_mode = #tpu.pipeline_mode<synchronous>, transform_indices = @transform_5, window_bounds = array<i64: 16, 4>}, {pipeline_mode = #tpu.pipeline_mode<synchronous>, transform_indices = @transform_6, window_bounds = array<i64: 16, 1>}, {pipeline_mode = #tpu.pipeline_mode<synchronous>, transform_indices = @transform_7, window_bounds = array<i64: 16, 1>}, {pipeline_mode = #tpu.pipeline_mode<synchronous>, transform_indices = @transform_8, window_bounds = array<i64: 32, 16>}, {pipeline_mode = #tpu.pipeline_mode<synchronous>, transform_indices = @transform_9, window_bounds = array<i64: 32, 1>}, {pipeline_mode = #tpu.pipeline_mode<synchronous>, transform_indices = @transform_10, window_bounds = array<i64: 32, 1>}, {transform_indices = @transform_11, window_bounds = array<i64: 1, 32, 16>}]} {
    %c0 = arith.constant 0 : index
    %c0_0 = arith.constant 0 : index
    %c0_1 = arith.constant 0 : index
    %0 = vector.load %arg2[%c0, %c0_0, %c0_1] : memref<1x3x16xf32, #tpu.memory_space<vmem>>, vector<1x3x16xf32>
    %1 = vector.shape_cast %0 : vector<1x3x16xf32> to vector<3x16xf32>
    %c0_2 = arith.constant 0 : index
    %c0_3 = arith.constant 0 : index
    %c0_4 = arith.constant 0 : index
    %2 = vector.load %arg3[%c0_2, %c0_3, %c0_4] : memref<1x8x3xf32, #tpu.memory_space<vmem>>, vector<1x8x3xf32>
    %3 = vector.shape_cast %2 : vector<1x8x3xf32> to vector<8x3xf32>
    %c0_5 = arith.constant 0 : index
    %c0_6 = arith.constant 0 : index
    %c0_7 = arith.constant 0 : index
    %4 = vector.load %arg4[%c0_5, %c0_6, %c0_7] : memref<1x6x8xbf16, #tpu.memory_space<vmem>>, vector<1x6x8xbf16>
    %5 = vector.shape_cast %4 : vector<1x6x8xbf16> to vector<6x8xbf16>
    %cst = arith.constant 0.000000e+00 : f32
    %6 = vector.broadcast %cst : f32 to vector<8x16xf32>
    %7 = vector.extract_strided_slice %3 {offsets = [0, 0], sizes = [8, 1], strides = [1, 1]} : vector<8x3xf32> to vector<8x1xf32>
    %8 = vector.extract_strided_slice %1 {offsets = [0, 0], sizes = [1, 16], strides = [1, 1]} : vector<3x16xf32> to vector<1x16xf32>
    %9 = vector.broadcast %7 : vector<8x1xf32> to vector<8x16xf32>
    %10 = vector.broadcast %8 : vector<1x16xf32> to vector<8x16xf32>
    %11 = arith.subf %9, %10 : vector<8x16xf32>
    %12 = arith.mulf %11, %11 : vector<8x16xf32>
    %13 = arith.addf %6, %12 : vector<8x16xf32>
    %14 = vector.extract_strided_slice %3 {offsets = [0, 1], sizes = [8, 1], strides = [1, 1]} : vector<8x3xf32> to vector<8x1xf32>
    %15 = vector.extract_strided_slice %1 {offsets = [1, 0], sizes = [1, 16], strides = [1, 1]} : vector<3x16xf32> to vector<1x16xf32>
    %16 = vector.broadcast %14 : vector<8x1xf32> to vector<8x16xf32>
    %17 = vector.broadcast %15 : vector<1x16xf32> to vector<8x16xf32>
    %18 = arith.subf %16, %17 : vector<8x16xf32>
    %19 = arith.mulf %18, %18 : vector<8x16xf32>
    %20 = arith.addf %13, %19 : vector<8x16xf32>
    %21 = vector.extract_strided_slice %3 {offsets = [0, 2], sizes = [8, 1], strides = [1, 1]} : vector<8x3xf32> to vector<8x1xf32>
    %22 = vector.extract_strided_slice %1 {offsets = [2, 0], sizes = [1, 16], strides = [1, 1]} : vector<3x16xf32> to vector<1x16xf32>
    %23 = vector.broadcast %21 : vector<8x1xf32> to vector<8x16xf32>
    %24 = vector.broadcast %22 : vector<1x16xf32> to vector<8x16xf32>
    %25 = arith.subf %23, %24 : vector<8x16xf32>
    %26 = arith.mulf %25, %25 : vector<8x16xf32>
    %27 = arith.addf %20, %26 : vector<8x16xf32>
    %28 = tpu.iota {dimensions = array<i32: 0>} : vector<8x16xi32>
    %cst_8 = arith.constant dense<0x7F800000> : vector<16xf32>
    %29 = vector.multi_reduction <minimumf>, %27, %cst_8 [0] : vector<8x16xf32> to vector<16xf32>
    %30 = vector.shape_cast %29 : vector<16xf32> to vector<1x16xf32>
    %31 = vector.broadcast %30 : vector<1x16xf32> to vector<8x16xf32>
    %32 = arith.cmpf oeq, %27, %31 : vector<8x16xf32>
    %c8_i32 = arith.constant 8 : i32
    %33 = vector.broadcast %c8_i32 : i32 to vector<8x16xi32>
    %34 = arith.select %32, %28, %33 : vector<8x16xi1>, vector<8x16xi32>
    %cst_9 = arith.constant dense<2147483647> : vector<16xi32>
    %35 = vector.multi_reduction <minsi>, %34, %cst_9 [0] : vector<8x16xi32> to vector<16xi32>
    %36 = vector.shape_cast %35 : vector<16xi32> to vector<1x16xi32>
    %37 = math.sqrt %30 : vector<1x16xf32>
    %cst_10 = arith.constant 9.99999993E-9 : f32
    %38 = vector.broadcast %cst_10 : f32 to vector<1x16xf32>
    %39 = arith.addf %37, %38 : vector<1x16xf32>
    %cst_11 = arith.constant 1.000000e+00 : f32
    %40 = vector.broadcast %cst_11 : f32 to vector<1x16xf32>
    %41 = arith.divf %40, %39 : vector<1x16xf32>
    %42 = vector.broadcast %36 : vector<1x16xi32> to vector<8x16xi32>
    %43 = arith.cmpi eq, %28, %42 : vector<8x16xi32>
    %cst_12 = arith.constant 3.000000e+38 : f32
    %44 = vector.broadcast %cst_12 : f32 to vector<8x16xf32>
    %45 = arith.select %43, %44, %27 : vector<8x16xi1>, vector<8x16xf32>
    %cst_13 = arith.constant dense<0x7F800000> : vector<16xf32>
    %46 = vector.multi_reduction <minimumf>, %45, %cst_13 [0] : vector<8x16xf32> to vector<16xf32>
    %47 = vector.shape_cast %46 : vector<16xf32> to vector<1x16xf32>
    %48 = vector.broadcast %47 : vector<1x16xf32> to vector<8x16xf32>
    %49 = arith.cmpf oeq, %45, %48 : vector<8x16xf32>
    %c8_i32_14 = arith.constant 8 : i32
    %50 = vector.broadcast %c8_i32_14 : i32 to vector<8x16xi32>
    %51 = arith.select %49, %28, %50 : vector<8x16xi1>, vector<8x16xi32>
    %cst_15 = arith.constant dense<2147483647> : vector<16xi32>
    %52 = vector.multi_reduction <minsi>, %51, %cst_15 [0] : vector<8x16xi32> to vector<16xi32>
    %53 = vector.shape_cast %52 : vector<16xi32> to vector<1x16xi32>
    %54 = math.sqrt %47 : vector<1x16xf32>
    %cst_16 = arith.constant 9.99999993E-9 : f32
    %55 = vector.broadcast %cst_16 : f32 to vector<1x16xf32>
    %56 = arith.addf %54, %55 : vector<1x16xf32>
    %cst_17 = arith.constant 1.000000e+00 : f32
    %57 = vector.broadcast %cst_17 : f32 to vector<1x16xf32>
    %58 = arith.divf %57, %56 : vector<1x16xf32>
    %59 = vector.broadcast %53 : vector<1x16xi32> to vector<8x16xi32>
    %60 = arith.cmpi eq, %28, %59 : vector<8x16xi32>
    %cst_18 = arith.constant 3.000000e+38 : f32
    %61 = vector.broadcast %cst_18 : f32 to vector<8x16xf32>
    %62 = arith.select %60, %61, %45 : vector<8x16xi1>, vector<8x16xf32>
    %cst_19 = arith.constant dense<0x7F800000> : vector<16xf32>
    %63 = vector.multi_reduction <minimumf>, %62, %cst_19 [0] : vector<8x16xf32> to vector<16xf32>
    %64 = vector.shape_cast %63 : vector<16xf32> to vector<1x16xf32>
    %65 = vector.broadcast %64 : vector<1x16xf32> to vector<8x16xf32>
    %66 = arith.cmpf oeq, %62, %65 : vector<8x16xf32>
    %c8_i32_20 = arith.constant 8 : i32
    %67 = vector.broadcast %c8_i32_20 : i32 to vector<8x16xi32>
    %68 = arith.select %66, %28, %67 : vector<8x16xi1>, vector<8x16xi32>
    %cst_21 = arith.constant dense<2147483647> : vector<16xi32>
    %69 = vector.multi_reduction <minsi>, %68, %cst_21 [0] : vector<8x16xi32> to vector<16xi32>
    %70 = vector.shape_cast %69 : vector<16xi32> to vector<1x16xi32>
    %71 = math.sqrt %64 : vector<1x16xf32>
    %cst_22 = arith.constant 9.99999993E-9 : f32
    %72 = vector.broadcast %cst_22 : f32 to vector<1x16xf32>
    %73 = arith.addf %71, %72 : vector<1x16xf32>
    %cst_23 = arith.constant 1.000000e+00 : f32
    %74 = vector.broadcast %cst_23 : f32 to vector<1x16xf32>
    %75 = arith.divf %74, %73 : vector<1x16xf32>
    %76 = arith.addf %41, %58 : vector<1x16xf32>
    %77 = arith.addf %76, %75 : vector<1x16xf32>
    %cst_24 = arith.constant 1.000000e+00 : f32
    %78 = vector.broadcast %cst_24 : f32 to vector<1x16xf32>
    %79 = arith.divf %78, %77 : vector<1x16xf32>
    %80 = arith.mulf %41, %79 : vector<1x16xf32>
    %81 = arith.mulf %58, %79 : vector<1x16xf32>
    %82 = arith.mulf %75, %79 : vector<1x16xf32>
    %83 = vector.broadcast %36 : vector<1x16xi32> to vector<8x16xi32>
    %84 = arith.cmpi eq, %28, %83 : vector<8x16xi32>
    %85 = vector.broadcast %53 : vector<1x16xi32> to vector<8x16xi32>
    %86 = arith.cmpi eq, %28, %85 : vector<8x16xi32>
    %87 = vector.broadcast %70 : vector<1x16xi32> to vector<8x16xi32>
    %88 = arith.cmpi eq, %28, %87 : vector<8x16xi32>
    %cst_25 = arith.constant 0.000000e+00 : f32
    %89 = vector.shape_cast %82 : vector<1x16xf32> to vector<1x16xf32>
    %90 = vector.broadcast %89 : vector<1x16xf32> to vector<8x16xf32>
    %91 = vector.broadcast %cst_25 : f32 to vector<8x16xf32>
    %92 = arith.select %88, %90, %91 : vector<8x16xi1>, vector<8x16xf32>
    %93 = vector.shape_cast %81 : vector<1x16xf32> to vector<1x16xf32>
    %94 = vector.broadcast %93 : vector<1x16xf32> to vector<8x16xf32>
    %95 = arith.select %86, %94, %92 : vector<8x16xi1>, vector<8x16xf32>
    %96 = vector.shape_cast %80 : vector<1x16xf32> to vector<1x16xf32>
    %97 = vector.broadcast %96 : vector<1x16xf32> to vector<8x16xf32>
    %98 = arith.select %84, %97, %95 : vector<8x16xi1>, vector<8x16xf32>
    %99 = arith.truncf %98 : vector<8x16xf32> to vector<8x16xbf16>
    %cst_26 = arith.constant dense<0.000000e+00> : vector<6x16xf32>
    %100 = tpu.matmul %5, %99, %cst_26 {dimension_numbers = #tpu.dot_dimension_numbers<[1], [0], [0], [1], [0, 0, 1, 1], [], []>} : vector<6x8xbf16>, vector<8x16xbf16>, vector<6x16xf32> -> vector<6x16xf32>
    %c0_27 = arith.constant 0 : index
    %c0_28 = arith.constant 0 : index
    %101 = vector.load %arg6[%c0_27, %c0_28] : memref<16x6xbf16, #tpu.memory_space<vmem>>, vector<16x6xbf16>
    %c0_29 = arith.constant 0 : index
    %c0_30 = arith.constant 0 : index
    %102 = vector.load %arg7[%c0_29, %c0_30] : memref<16x4xbf16, #tpu.memory_space<vmem>>, vector<16x4xbf16>
    %c0_31 = arith.constant 0 : index
    %c0_32 = arith.constant 0 : index
    %103 = vector.load %arg8[%c0_31, %c0_32] : memref<16x1xf32, #tpu.memory_space<vmem>>, vector<16x1xf32>
    %c0_33 = arith.constant 0 : index
    %c0_34 = arith.constant 0 : index
    %104 = vector.load %arg9[%c0_33, %c0_34] : memref<16x1xf32, #tpu.memory_space<vmem>>, vector<16x1xf32>
    %105 = arith.truncf %100 : vector<6x16xf32> to vector<6x16xbf16>
    %cst_35 = arith.constant dense<0.000000e+00> : vector<16x16xf32>
    %106 = tpu.matmul %101, %105, %cst_35 {dimension_numbers = #tpu.dot_dimension_numbers<[1], [0], [0], [1], [0, 0, 1, 1], [], []>} : vector<16x6xbf16>, vector<6x16xbf16>, vector<16x16xf32> -> vector<16x16xf32>
    %c0_36 = arith.constant 0 : index
    %c0_37 = arith.constant 0 : index
    %c0_38 = arith.constant 0 : index
    %107 = vector.load %arg5[%c0_36, %c0_37, %c0_38] : memref<1x4x16xbf16, #tpu.memory_space<vmem>>, vector<1x4x16xbf16>
    %108 = vector.shape_cast %107 : vector<1x4x16xbf16> to vector<4x16xbf16>
    %cst_39 = arith.constant dense<0.000000e+00> : vector<16x16xf32>
    %109 = tpu.matmul %102, %108, %cst_39 {dimension_numbers = #tpu.dot_dimension_numbers<[1], [0], [0], [1], [0, 0, 1, 1], [], []>} : vector<16x4xbf16>, vector<4x16xbf16>, vector<16x16xf32> -> vector<16x16xf32>
    %110 = arith.addf %106, %109 : vector<16x16xf32>
    %111 = vector.broadcast %103 : vector<16x1xf32> to vector<16x16xf32>
    %112 = arith.mulf %110, %111 : vector<16x16xf32>
    %113 = vector.broadcast %104 : vector<16x1xf32> to vector<16x16xf32>
    %114 = arith.addf %112, %113 : vector<16x16xf32>
    %cst_40 = arith.constant 0.000000e+00 : f32
    %115 = vector.broadcast %cst_40 : f32 to vector<16x16xf32>
    %116 = arith.maximumf %114, %115 : vector<16x16xf32>
    %c0_41 = arith.constant 0 : index
    %c0_42 = arith.constant 0 : index
    %117 = vector.load %arg10[%c0_41, %c0_42] : memref<32x16xbf16, #tpu.memory_space<vmem>>, vector<32x16xbf16>
    %c0_43 = arith.constant 0 : index
    %c0_44 = arith.constant 0 : index
    %118 = vector.load %arg11[%c0_43, %c0_44] : memref<32x1xf32, #tpu.memory_space<vmem>>, vector<32x1xf32>
    %c0_45 = arith.constant 0 : index
    %c0_46 = arith.constant 0 : index
    %119 = vector.load %arg12[%c0_45, %c0_46] : memref<32x1xf32, #tpu.memory_space<vmem>>, vector<32x1xf32>
    %120 = arith.truncf %116 : vector<16x16xf32> to vector<16x16xbf16>
    %cst_47 = arith.constant dense<0.000000e+00> : vector<32x16xf32>
    %121 = tpu.matmul %117, %120, %cst_47 {dimension_numbers = #tpu.dot_dimension_numbers<[1], [0], [0], [1], [0, 0, 1, 1], [], []>} : vector<32x16xbf16>, vector<16x16xbf16>, vector<32x16xf32> -> vector<32x16xf32>
    %122 = vector.broadcast %118 : vector<32x1xf32> to vector<32x16xf32>
    %123 = arith.mulf %121, %122 : vector<32x16xf32>
    %124 = vector.broadcast %119 : vector<32x1xf32> to vector<32x16xf32>
    %125 = arith.addf %123, %124 : vector<32x16xf32>
    %cst_48 = arith.constant 0.000000e+00 : f32
    %126 = vector.broadcast %cst_48 : f32 to vector<32x16xf32>
    %127 = arith.maximumf %125, %126 : vector<32x16xf32>
    %c0_49 = arith.constant 0 : index
    %c0_50 = arith.constant 0 : index
    %c0_51 = arith.constant 0 : index
    %128 = vector.load %arg13[%c0_49, %c0_50, %c0_51] : memref<1x32x16xf32, #tpu.memory_space<vmem>>, vector<1x32x16xf32>
    %129 = vector.shape_cast %128 : vector<1x32x16xf32> to vector<32x16xf32>
    %130 = vector.shape_cast %127 : vector<32x16xf32> to vector<1x32x16xf32>
    tpu.vector_store %arg13[%c0_49, %c0_50, %c0_51], %130 {strides = array<i32>} : memref<1x32x16xf32, #tpu.memory_space<vmem>>, vector<1x32x16xf32>,
    return
  }
  func.func @transform_0(%arg0: i32, %arg1: i32) -> (i32, i32, i32) {
    %c0_i32 = arith.constant 0 : i32
    %c0_i32_0 = arith.constant 0 : i32
    return %arg0, %c0_i32, %arg1 : i32, i32, i32
  }
  func.func @transform_1(%arg0: i32, %arg1: i32) -> (i32, i32, i32) {
    %c0_i32 = arith.constant 0 : i32
    %c0_i32_0 = arith.constant 0 : i32
    %c0_i32_1 = arith.constant 0 : i32
    return %arg0, %c0_i32, %c0_i32_0 : i32, i32, i32
  }
  func.func @transform_2(%arg0: i32, %arg1: i32) -> (i32, i32, i32) {
    %c0_i32 = arith.constant 0 : i32
    %c0_i32_0 = arith.constant 0 : i32
    %c0_i32_1 = arith.constant 0 : i32
    return %arg0, %c0_i32, %c0_i32_0 : i32, i32, i32
  }
  func.func @transform_3(%arg0: i32, %arg1: i32) -> (i32, i32, i32) {
    %c0_i32 = arith.constant 0 : i32
    %c0_i32_0 = arith.constant 0 : i32
    return %arg0, %c0_i32, %arg1 : i32, i32, i32
  }
  func.func @transform_4(%arg0: i32, %arg1: i32) -> (i32, i32) {
    %c0_i32 = arith.constant 0 : i32
    %c0_i32_0 = arith.constant 0 : i32
    %c0_i32_1 = arith.constant 0 : i32
    return %c0_i32, %c0_i32_0 : i32, i32
  }
  func.func @transform_5(%arg0: i32, %arg1: i32) -> (i32, i32) {
    %c0_i32 = arith.constant 0 : i32
    %c0_i32_0 = arith.constant 0 : i32
    %c0_i32_1 = arith.constant 0 : i32
    return %c0_i32, %c0_i32_0 : i32, i32
  }
  func.func @transform_6(%arg0: i32, %arg1: i32) -> (i32, i32) {
    %c0_i32 = arith.constant 0 : i32
    %c0_i32_0 = arith.constant 0 : i32
    %c0_i32_1 = arith.constant 0 : i32
    return %c0_i32, %c0_i32_0 : i32, i32
  }
  func.func @transform_7(%arg0: i32, %arg1: i32) -> (i32, i32) {
    %c0_i32 = arith.constant 0 : i32
    %c0_i32_0 = arith.constant 0 : i32
    %c0_i32_1 = arith.constant 0 : i32
    return %c0_i32, %c0_i32_0 : i32, i32
  }
  func.func @transform_8(%arg0: i32, %arg1: i32) -> (i32, i32) {
    %c0_i32 = arith.constant 0 : i32
    %c0_i32_0 = arith.constant 0 : i32
    %c0_i32_1 = arith.constant 0 : i32
    return %c0_i32, %c0_i32_0 : i32, i32
  }
  func.func @transform_9(%arg0: i32, %arg1: i32) -> (i32, i32) {
    %c0_i32 = arith.constant 0 : i32
    %c0_i32_0 = arith.constant 0 : i32
    %c0_i32_1 = arith.constant 0 : i32
    return %c0_i32, %c0_i32_0 : i32, i32
  }
  func.func @transform_10(%arg0: i32, %arg1: i32) -> (i32, i32) {
    %c0_i32 = arith.constant 0 : i32
    %c0_i32_0 = arith.constant 0 : i32
    %c0_i32_1 = arith.constant 0 : i32
    return %c0_i32, %c0_i32_0 : i32, i32
  }
  func.func @transform_11(%arg0: i32, %arg1: i32) -> (i32, i32, i32) {
    %c0_i32 = arith.constant 0 : i32
    %c0_i32_0 = arith.constant 0 : i32
    return %arg0, %c0_i32, %arg1 : i32, i32, i32
  }
}

</mosaic_0001>

<bundles_post_ra>
// kernel: tpu_custom_call.1
= control target key start
LH: loop header
LB: loop body
LE: loop exit
PB: predicated region body
PF: predicated region fallthrough
CT: control target
= control target key end

     0   :  { %s1263_s17 = smov 0   ;;  %s1265_s18 = smov 0   ;;  %s1413_s0 = inlined_call_operand.vmem [shape: f32[2,3,16], index: 0, kind: input, shape index: {}]   ;;  %s1414_s1 = inlined_call_operand.vmem [shape: f32[2,8,3], index: 1, kind: input, shape index: {}]   ;;  %s1415_s2 = inlined_call_operand.vmem [shape: bf16[2,6,8], index: 2, kind: input, shape index: {}]   ;;  %s1416_s3 = inlined_call_operand.vmem [shape: bf16[2,4,16], index: 3, kind: input, shape index: {}]   ;;  %s1417_s4 = inlined_call_operand.vmem [shape: bf16[16,6], index: 4, kind: input, shape index: {}]   ;;  %s1418_s5 = inlined_call_operand.vmem [shape: bf16[16,4], index: 5, kind: input, shape index: {}]   ;;  %s1419_s6 = inlined_call_operand.vmem [shape: f32[16,1], index: 6, kind: input, shape index: {}]   ;;  %s1420_s7 = inlined_call_operand.vmem [shape: f32[16,1], index: 7, kind: input, shape index: {}]   ;;  %s1421_s8 = inlined_call_operand.vmem [shape: bf16[32,16], index: 8, kind: input, shape index: {}]   ;;  %s1422_s9 = inlined_call_operand.vmem [shape: f32[32,1], index: 9, kind: input, shape index: {}]   ;;  %s1423_s10 = inlined_call_operand.vmem [shape: f32[32,1], index: 10, kind: input, shape index: {}]   ;;  %s1424_s11 = inlined_call_operand.vmem [shape: f32[2,32,16], index: 11, kind: output, shape index: {}]  }
   0x1   :  { %s1267_s19 = smov 0  }
   0x2 LB: > { %s33_s20 = sadd.s32 1, %s1192_s18  ;;  %p1070_p0 = scmp.ge.s32.totalorder %s1196_s19, 1  ;;  %s1196_s19 = sphi %s1267_s19, %s21_s19   ;;  %s1192_s18 = sphi %s1265_s18, %s1426_s18   ;;  %s1188_s17 = sphi %s1263_s17, %s1425_s17  }
   0x3   : > { %p35_p1 = scmp.ge.s32.totalorder %s33_s20, 2  ;;  %p387_p2 = scmp.lt.s32.totalorder %s1196_s19, 3 }
   0x5   : > { %s1428_s20 = smov (%p35_p1, %s33_s20), 0  ;;  %p388_p3 = pnand %p1070_p0, %p387_p2 }
   0x6   : > { %p447_p4 = scmp.lt.s32.totalorder (!%p388_p3), %s1188_s17, 1 }
   0x7   : > { %391 = sbr.rel (%p388_p3) target bundleno = 903 (0x387), region = 64 }
   0xc   : > { %v1198_v0 = vmov 0   ;;  %v1199_v1 = vmov 2   ;;  %s1430_s17 = smov (!%p447_p4, %s1188_s17), 1  ;;  %v1200_v3 = vmov 1   ;;  %v1201_v4 = vmov 0.0  }
   0xd   : > { %1151 = vset.pattern.permute.xlu0 %v1198_v0  ;;  %1153 = vset.pattern.permute.xlu1 %v1199_v1  ;;  %s1072_s21 = sshll.u32 %s1430_s17, 3  ;;  %v486_v5 = vlaneseq  ;;  %s1071_s25 = sshll.u32 %s1430_s17, 2  ;;  %vm517_vm0 = vcmask 130048   ;;  %vm1202_vm1 = vmmov 0   ;;  %vm688_vm2 = vcmask 1041408  }
   0xe   : > { %s457_s24 = scalar_lea.vmem %s1414_s1, %s1072_s21  ;;  %1098 = vmatprep.subr.bf16.mxu0 %v1201_v4  ;;  %1104 = vmatprep.subr.bf16.mxu1 %v1201_v4  ;;  %s453_s28 = scalar_lea.vmem %s1413_s0, %s1071_s25 }
   0xf   : > { %v479_v2 = vld [vmem:[%s457_s24] sm:$0xff]  ;;  %v1290_v6 = vshrl.u32 %v486_v5, 7  ;;  %1100 = vmatprep.mubr.msk.bf16.mxu0 %vm1202_vm1, %v1201_v4  ;;  %1106 = vmatprep.mubr.msk.bf16.mxu1 %vm1202_vm1, %v1201_v4  ;;  %s1074_s29 = sshll.u32 %s1430_s17, 1  ;;  %s461_s16 = scalar_lea.vmem %s1415_s2, %s1071_s25 }
  0x10   : > { %483 = vperm.xlu0 %1151, %v479_v2   ;;  %505 = vperm.xlu1 %1153, %v479_v2   ;;  %v478_v9 = vld [vmem:[%s453_s28] sm:$0x7]  ;;  %s468_s13 = scalar_lea.vmem %s1416_s3, %s1074_s29  ;;  %s1088_s23 = sshll.u32 %s1430_s17, 5 }
  0x11   : > { %v488_v7 = vsub.s32 0, %v1290_v6  ;;  %v510_v8 = vsub.s32 2, %v1290_v6  ;;  %v499_v10 = vsub.s32 1, %v1290_v6  ;;  %v678_v30 = vld [vmem:[%s468_s13] sm:$0x3]  ;;  %s476_s26 = scalar_lea.vmem %s1424_s11, %s1088_s23 }
  0x12   : > { %v690_v32 = vsel %vm688_vm2, %v678_v30, 0 }
  0x13   : > { %v489_v12 = vrot.slane %v478_v9, %v488_v7  ;;  %v511_v13 = vrot.slane %v478_v9, %v510_v8  ;;  %v500_v15 = vrot.slane %v478_v9, %v499_v10  ;;  %1105 = vmatpush3.bf16.msra.mxu1 %v690_v32 }
  0x14   : > { %1152 = vset.pattern.permute.xlu0 %v1200_v3  ;;  %1154 = vset.pattern.permute.xlu1 %v1198_v0 }
  0x15   : > { %494 = vperm.xlu0 %1152, %v479_v2  }
  0x19   : > { %1155 = vset.pattern.permute.xlu0 %v1198_v0 }
  0x8b   : > { %v484_v11 = vpop.permute.xlu0 %483  ;;  %v506_v14 = vpop.permute.xlu1 %505 }
  0x8c   : > { %v490_v16 = vsub.f32 %v484_v11, %v489_v12  ;;  %v512_v17 = vsub.f32 %v506_v14, %v511_v13 }
  0x8e   : > { %v491_v20 = vmul.f32 %v490_v16, %v490_v16  ;;  %v513_v22 = vmul.f32 %v512_v17, %v512_v17 }
  0x90   : > { %v495_v18 = vpop.permute.xlu0 %494 }
  0x91   : > { %v501_v19 = vsub.f32 %v495_v18, %v500_v15 }
  0x93   : > { %v502_v21 = vmul.f32 %v501_v19, %v501_v19 }
  0x95   : > { %v503_v23 = vadd.f32 %v502_v21, %v491_v20 }
  0x97   : > { %v514_v24 = vadd.f32 %v513_v22, %v503_v23 }
  0x99   : > { %v518_v25 = vsel %vm517_vm0, %v514_v24, inf }
  0x9a   : > { %v519_v26 = vrot.slane %v518_v25, 4 }
  0x9c   : > { %v520_v27 = vmin.f32 %v518_v25, %v519_v26 }
  0x9e   : > { %v521_v28 = vrot.slane %v520_v27, 2 }
  0xa0   : > { %v522_v29 = vmin.f32 %v520_v27, %v521_v28 }
  0xa2   : > { %v523_v31 = vrot.slane %v522_v29, 1 }
  0xa4   : > { %v524_v33 = vmin.f32 %v522_v29, %v523_v31 }
  0xa6   : > { %vm525_vm3 = vcmp.eq.f32.partialorder %v514_v24, %v524_v33  ;;  %vm539_vm14 = vcmp.eq.f32.partialorder %v524_v33, inf  ;;  %v542_v11 = vand.u32 2147483648, %v524_v33  ;;  %vm541_vm2 = vcmp.eq.f32.partialorder %v524_v33, 0.0 }
  0xa7   : > { %v526_v34 = vsel %vm525_vm3, %v1290_v6, 8 }
  0xa8   : > { %v527_v35 = vsel %vm517_vm0, %v526_v34, 2147483647 }
  0xa9   : > { %v528_v36 = vrot.slane %v527_v35, 4 }
  0xab   : > { %vm529_vm4 = vcmp.lt.s32.totalorder %v527_v35, %v528_v36 }
  0xac   : > { %v530_v37 = vsel %vm529_vm4, %v527_v35, %v528_v36 }
  0xad   : > { %v531_v38 = vrot.slane %v530_v37, 2 }
  0xaf   : > { %vm532_vm5 = vcmp.lt.s32.totalorder %v530_v37, %v531_v38 }
  0xb0   : > { %v533_v39 = vsel %vm532_vm5, %v530_v37, %v531_v38 }
  0xb1   : > { %v534_v40 = vrot.slane %v533_v39, 1 }
  0xb3   : > { %vm535_vm6 = vcmp.lt.s32.totalorder %v533_v39, %v534_v40 }
  0xb4   : > { %v1311_v41 = vsel %vm535_vm6, %v533_v39, %v534_v40 }
  0xb5   : > { %vm547_vm7 = vcmp.eq.s32.totalorder %v1290_v6, %v1311_v41  ;;  %v673_v41 = vld [vmem:[%s1419_s6] sm:$0xff] }
  0xb6   : > { %v548_v42 = vsel %vm547_vm7, 3e+38, %v514_v24  ;;  %789 = vperm.xlu1 %1154, %v673_v41  }
  0xb7   : > { %v549_v43 = vsel %vm517_vm0, %v548_v42, inf }
  0xb8   : > { %v550_v44 = vrot.slane %v549_v43, 4 }
  0xba   : > { %v551_v45 = vmin.f32 %v549_v43, %v550_v44 }
  0xbc   : > { %v552_v46 = vrot.slane %v551_v45, 2 }
  0xbe   : > { %v553_v47 = vmin.f32 %v551_v45, %v552_v46  ;;  %v480_v45 = vld [vmem:[%s461_s16] sm:$0x7] }
  0xbf   : > { %v675_v46 = vld [vmem:[%s1420_s7] sm:$0xff] }
  0xc0   : > { %v554_v48 = vrot.slane %v553_v47, 1  ;;  %801 = vperm.xlu0 %1155, %v675_v46  }
  0xc2   : > { %v555_v49 = vmin.f32 %v553_v47, %v554_v48  ;;  %v674_v47 = vld [vmem:[%s1419_s6 + $0x8] sm:$0xff] }
  0xc3   : > { %794 = vperm.xlu1 %1154, %v674_v47   ;;  %v676_v48 = vld [vmem:[%s1420_s7 + $0x8] sm:$0xff] }
  0xc4   : > { %vm556_vm8 = vcmp.eq.f32.partialorder %v548_v42, %v555_v49  ;;  %1160 = vrsqrt.f32 %v555_v49  ;;  %vm570_vm13 = vcmp.eq.f32.partialorder %v555_v49, inf  ;;  %v573_v9 = vand.u32 2147483648, %v555_v49 }
  0xc5   : > { %v557_v50 = vsel %vm556_vm8, %v1290_v6, 8  ;;  %1162 = vrsqrt.f32 %v524_v33  ;;  %vm572_vm15 = vcmp.eq.f32.partialorder %v555_v49, 0.0 }
  0xc6   : > { %v558_v51 = vsel %vm517_vm0, %v557_v50, 2147483647  ;;  %v817_v50 = vld [vmem:[%s1422_s9] sm:$0xff] }
  0xc7   : > { %v559_v52 = vrot.slane %v558_v51, 4  ;;  %806 = vperm.xlu1 %1154, %v676_v48  }
  0xc9   : > { %vm560_vm9 = vcmp.lt.s32.totalorder %v558_v51, %v559_v52 }
  0xca   : > { %v561_v53 = vsel %vm560_vm9, %v558_v51, %v559_v52  ;;  %v822_v51 = vld [vmem:[%s1423_s10 + $0x8] sm:$0xff]  ;;  %v819_v52 = vld [vmem:[%s1422_s9 + $0x10] sm:$0xff] }
  0xcb   : > { %v562_v54 = vrot.slane %v561_v53, 2  ;;  %893 = vperm.xlu1 %1154, %v817_v50  }
  0xcd   : > { %vm563_vm10 = vcmp.lt.s32.totalorder %v561_v53, %v562_v54 }
  0xce   : > { %v564_v55 = vsel %vm563_vm10, %v561_v53, %v562_v54  ;;  %v824_v53 = vld [vmem:[%s1423_s10 + $0x18] sm:$0xff]  ;;  %v821_v54 = vld [vmem:[%s1423_s10] sm:$0xff] }
  0xcf   : > { %v565_v56 = vrot.slane %v564_v55, 1  ;;  %903 = vperm.xlu1 %1154, %v819_v52  }
  0xd1   : > { %vm566_vm11 = vcmp.lt.s32.totalorder %v564_v55, %v565_v56  ;;  %v1161_v2 = vpop.eup %1160 }
  0xd2   : > { %v1321_v57 = vsel %vm566_vm11, %v564_v55, %v565_v56  ;;  %v1163_v3 = vpop.eup %1162  ;;  %v569_v5 = vmul.f32 %v1161_v2, %v555_v49  ;;  %vm625_vm11 = vcmask 1043456   ;;  %v823_v55 = vld [vmem:[%s1423_s10 + $0x10] sm:$0xff] }
  0xd3   : > { %vm578_vm12 = vcmp.eq.s32.totalorder %v1290_v6, %v1321_v57  ;;  %v538_v7 = vmul.f32 %v1163_v3, %v524_v33  ;;  %917 = vperm.xlu1 %1154, %v821_v54   ;;  %v1158_v3 = vld [vmem:[%s1421_s8] sm:$0xff]  }
  0xd4   : > { %v579_v58 = vsel %vm578_vm12, 3e+38, %v548_v42  ;;  %v571_v8 = vsel %vm570_vm13, %v555_v49, %v569_v5  ;;  %vm621_vm13 = vcmask 64512   ;;  %v820_v49 = vld [vmem:[%s1422_s9 + $0x18] sm:$0xff] }
  0xd5   : > { %v580_v59 = vsel %vm517_vm0, %v579_v58, inf  ;;  %v540_v10 = vsel %vm539_vm14, %v524_v33, %v538_v7  ;;  %v574_v12 = vsel %vm572_vm15, %v573_v9, %v571_v8 }
  0xd6   : > { %v581_v60 = vrot.slane %v580_v59, 4  ;;  %v543_v13 = vsel %vm541_vm2, %v542_v11, %v540_v10  ;;  %v575_v14 = vadd.f32 1e-08, %v574_v12 }
  0xd7   : > { %v544_v16 = vadd.f32 1e-08, %v543_v13  ;;  %927 = vperm.xlu1 %1154, %v823_v55  }
  0xd8   : > { %v582_v61 = vmin.f32 %v580_v59, %v581_v60  ;;  %v1157_v60 = vld [vmem:[%s1417_s4] sm:$0xff]  }
  0xda   : > { %v583_v62 = vrot.slane %v582_v61, 2 }
  0xdc   : > { %v584_v63 = vmin.f32 %v582_v61, %v583_v62 }
  0xde   : > { %v585_v0 = vrot.slane %v584_v63, 1 }
  0xe0   : > { %v586_v1 = vmin.f32 %v584_v63, %v585_v0 }
  0xe2   : > { %1164 = vrsqrt.f32 %v586_v1  ;;  %vm587_vm3 = vcmp.eq.f32.partialorder %v579_v58, %v586_v1  ;;  %vm601_vm4 = vcmp.eq.f32.partialorder %v586_v1, inf  ;;  %v604_v19 = vand.u32 2147483648, %v586_v1 }
  0xe3   : > { %v588_v18 = vsel %vm587_vm3, %v1290_v6, 8  ;;  %1166 = vrcp.f32 %v575_v14  ;;  %vm603_vm5 = vcmp.eq.f32.partialorder %v586_v1, 0.0 }
  0xe4   : > { %1168 = vrcp.f32 %v544_v16  ;;  %v589_v22 = vsel %vm517_vm0, %v588_v18, 2147483647 }
  0xe5   : > { %v590_v24 = vrot.slane %v589_v22, 4 }
  0xe7   : > { %vm591_vm6 = vcmp.lt.s32.totalorder %v589_v22, %v590_v24 }
  0xe8   : > { %v592_v25 = vsel %vm591_vm6, %v589_v22, %v590_v24 }
  0xe9   : > { %v593_v28 = vrot.slane %v592_v25, 2 }
  0xeb   : > { %vm594_vm8 = vcmp.lt.s32.totalorder %v592_v25, %v593_v28 }
  0xec   : > { %v595_v32 = vsel %vm594_vm8, %v592_v25, %v593_v28 }
  0xed   : > { %v596_v33 = vrot.slane %v595_v32, 1 }
  0xef   : > { %v1165_v15 = vpop.eup %1164  ;;  %vm597_vm9 = vcmp.lt.s32.totalorder %v595_v32, %v596_v33 }
  0xf0   : > { %v600_v17 = vmul.f32 %v1165_v15, %v586_v1  ;;  %v1167_v26 = vpop.eup %1166  ;;  %v598_v34 = vsel %vm597_vm9, %v595_v32, %v596_v33 }
  0xf1   : > { %v1169_v27 = vpop.eup %1168  ;;  %vm616_vm10 = vcmp.eq.s32.totalorder %v1290_v6, %v598_v34  ;;  %v1156_v6 = vld [vmem:[%s1418_s5] sm:$0xff]  }
  0xf2   : > { %v602_v20 = vsel %vm601_vm4, %v586_v1, %v600_v17  ;;  %v609_v29 = vadd.f32 %v1169_v27, %v1167_v26 }
  0xf3   : > { %v605_v21 = vsel %vm603_vm5, %v604_v19, %v602_v20 }
  0xf4   : > { %v606_v23 = vadd.f32 1e-08, %v605_v21 }
  0xf6   : > { %1170 = vrcp.f32 %v606_v23  ;;  %v1159_v23 = vld [vmem:[%s1421_s8 + $0x8] sm:$0xff]  }
 0x103   : > { %v1171_v30 = vpop.eup %1170 }
 0x104   : > { %v610_v31 = vadd.f32 %v1171_v30, %v609_v29 }
 0x106   : > { %1172 = vrcp.f32 %v610_v31 }
 0x113   : > { %v1173_v35 = vpop.eup %1172 }
 0x114   : > { %v614_v36 = vmul.f32 %v1173_v35, %v1167_v26  ;;  %v615_v37 = vmul.f32 %v1173_v35, %v1171_v30  ;;  %v613_v38 = vmul.f32 %v1173_v35, %v1169_v27 }
 0x116   : > { %v617_v39 = vsel %vm616_vm10, %v615_v37, 0.0 }
 0x117   : > { %v618_v40 = vsel %vm578_vm12, %v614_v36, %v617_v39  ;;  %vm738_vm12 = vcmask 48128  }
 0x118   : > { %v619_v42 = vsel %vm547_vm7, %v613_v38, %v618_v40  ;;  %vm684_vm7 = vcmask 31744  }
 0x119   : > { %v620_v43 = vpack.c.bf16 %v619_v42, %v619_v42  ;;  %1107 = vmatmul.mubr.msk.bf16.vlgmr.msra.gmra.mxu1 %vm684_vm7, %v1156_v6 }
 0x11a   : > { %1118 = vmatprep.mubr.msk.bf16.mxu1 %vm517_vm0, %v1158_v3 }
 0x11b   : > { %v627_v44 = vsel %vm625_vm11, %v620_v43, 0 }
 0x11c   : > { %1099 = vmatpush3.bf16.msra.mxu0 %v627_v44 }
 0x11d   : > { %1110 = vmatprep.subr.bf16.mxu0 %v1201_v4 }
 0x11f   : > { %1101 = vmatmul.mubr.msk.bf16.vlgmr.msra.gmra.mxu0 %vm621_vm13, %v480_v45 }
 0x120   : > { %1112 = vmatprep.mubr.msk.bf16.mxu0 %vm1202_vm1, %v1201_v4  ;;  %v818_v4 = vld [vmem:[%s1422_s9 + $0x8] sm:$0xff]  ;;  %vm742_vm1 = vcmask 1042432  }
 0x121   : > { %898 = vperm.xlu0 %1155, %v818_v4  }
 0x125   : > { %908 = vperm.xlu0 %1155, %v820_v49  }
 0x129   : > { %922 = vperm.xlu0 %1155, %v822_v51  }
 0x12d   : > { %932 = vperm.xlu0 %1155, %v824_v53  }
 0x131   : > { %v790_v5 = vpop.permute.xlu1 %789 }
 0x13b   : > { %v802_v14 = vpop.permute.xlu0 %801 }
 0x13e   : > { %v795_v9 = vpop.permute.xlu1 %794 }
 0x142   : > { %v807_v18 = vpop.permute.xlu1 %806 }
 0x146   : > { %v894_v24 = vpop.permute.xlu1 %893 }
 0x14a   : > { %v904_v26 = vpop.permute.xlu1 %903 }
 0x14e   : > { %v918_v28 = vpop.permute.xlu1 %917 }
 0x152   : > { %v928_v32 = vpop.permute.xlu1 %927 }
 0x19c   : > { %v899_v25 = vpop.permute.xlu0 %898 }
 0x1a0   : > { %v909_v27 = vpop.permute.xlu0 %908 }
 0x1a4   : > { %v923_v29 = vpop.permute.xlu0 %922 }
 0x1a8   : > { %v933_v40 = vpop.permute.xlu0 %932 }
 0x1d9   : > { %v726_v63 = vpop.f32.mrf.mxu1 }
 0x1db   : > { %v1108_v0 = vpop.f32.mrf.mxu1 }
 0x1dd   : > { %v729_v1 = vpop.f32.mrf.mxu1 }
 0x1df   : > { %v663_v56 = vpop.f32.mrf.mxu0  ;;  %v1109_v2 = vpop.f32.mrf.mxu1 }
 0x1e0   : > { %v677_v57 = vpack.c.bf16 %v663_v56, %v663_v56 }
 0x1e1   : > { %v1102_v58 = vpop.f32.mrf.mxu0 }
 0x1e2   : > { %v744_v59 = vsel %vm742_vm1, %v677_v57, 0 }
 0x1e3   : > { %v666_v61 = vpop.f32.mrf.mxu0  ;;  %1111 = vmatpush3.bf16.msra.mxu0 %v744_v59 }
 0x1e5   : > { %v1103_v62 = vpop.f32.mrf.mxu0 }
 0x1e6   : > { %1113 = vmatmul.mubr.msk.bf16.vlgmr.msra.gmra.mxu0 %vm738_vm12, %v1157_v60 }
 0x2a6   : > { %v780_v7 = vpop.f32.mrf.mxu0 }
 0x2a7   : > { %v781_v8 = vadd.f32 %v780_v7, %v726_v63 }
 0x2a8   : > { %v1114_v10 = vpop.f32.mrf.mxu0 }
 0x2a9   : > { %v797_v11 = vmul.f32 %v790_v5, %v781_v8 }
 0x2aa   : > { %v783_v12 = vpop.f32.mrf.mxu0 }
 0x2ab   : > { %v784_v13 = vadd.f32 %v783_v12, %v729_v1  ;;  %v809_v16 = vadd.f32 %v802_v14, %v797_v11 }
 0x2ac   : > { %v1115_v15 = vpop.f32.mrf.mxu0 }
 0x2ad   : > { %v798_v17 = vmul.f32 %v795_v9, %v784_v13  ;;  %v811_v20 = vmax.f32 %v809_v16, 0.0 }
 0x2af   : > { %v810_v19 = vadd.f32 %v807_v18, %v798_v17 }
 0x2b1   : > { %v812_v21 = vmax.f32 %v810_v19, 0.0 }
 0x2b3   : > { %v825_v22 = vpack.c.bf16 %v812_v21, %v811_v20 }
 0x2b5   : > { %1116 = vmatprep.subr.bf16.mxu1 %v825_v22 }
 0x2b6   : > { %1117 = vmatpush3.bf16.msra.mxu1 %v825_v22 }
 0x2b9   : > { %1119 = vmatmul.mubr.msk.bf16.vlgmr.msra.gmra.mxu1 %vm517_vm0, %v1159_v23 }
 0x379   : > { %v1120_v30 = vpop.f32.mrf.mxu1 }
 0x37a   : > { %v913_v31 = vmul.f32 %v1120_v30, %v904_v26 }
 0x37b   : > { %v876_v33 = vpop.f32.mrf.mxu1 }
 0x37c   : > { %v937_v34 = vadd.f32 %v928_v32, %v913_v31  ;;  %v911_v35 = vmul.f32 %v894_v24, %v876_v33 }
 0x37d   : > { %v1121_v36 = vpop.f32.mrf.mxu1 }
 0x37e   : > { %v941_v37 = vmax.f32 %v937_v34, 0.0  ;;  %v935_v38 = vadd.f32 %v918_v28, %v911_v35  ;;  %v914_v39 = vmul.f32 %v1121_v36, %v909_v27 }
 0x37f   : > { %v879_v42 = vpop.f32.mrf.mxu1 }
 0x380   : > { %945 = vst.msk [vmem:[%s476_s26 + $0x10] sm:$0xff] %vm517_vm0, %v941_v37  ;;  %v939_v43 = vmax.f32 %v935_v38, 0.0  ;;  %v938_v44 = vadd.f32 %v933_v40, %v914_v39  ;;  %v912_v45 = vmul.f32 %v899_v25, %v879_v42 }
 0x382   : > { %943 = vst.msk [vmem:[%s476_s26] sm:$0xff] %vm517_vm0, %v939_v43  ;;  %v942_v6 = vmax.f32 %v938_v44, 0.0  ;;  %v936_v41 = vadd.f32 %v923_v29, %v912_v45 }
 0x384   : > { %946 = vst.msk [vmem:[%s476_s26 + $0x18] sm:$0xff] %vm517_vm0, %v942_v6  ;;  %v940_v46 = vmax.f32 %v936_v41, 0.0 }
 0x386   : > { %944 = vst.msk [vmem:[%s476_s26 + $0x8] sm:$0xff] %vm517_vm0, %v940_v46 }
 0x387 PF: > { %s21_s19 = sadd.s32 1, %s1196_s19   ;;  %s1425_s17 = smov %s1192_s18 }
 0x388   : > { %p18_p5 = scmp.ge.s32.totalorder %s21_s19, 4   ;;  %s1426_s18 = smov %s1428_s20 }
 0x38a   :  { %20 = sbr.rel (!%p18_p5) target bundleno = 2 (0x2), region = 103 }

// kernel: tpu_custom_call.1
= control target key start
LH: loop header
LB: loop body
LE: loop exit
PB: predicated region body
PF: predicated region fallthrough
CT: control target
= control target key end

     0   :  { %s1263_s17 = smov 0   ;;  %s1265_s18 = smov 0   ;;  %s1413_s0 = inlined_call_operand.vmem [shape: f32[2,3,16], index: 0, kind: input, shape index: {}]   ;;  %s1414_s1 = inlined_call_operand.vmem [shape: f32[2,8,3], index: 1, kind: input, shape index: {}]   ;;  %s1415_s2 = inlined_call_operand.vmem [shape: bf16[2,6,8], index: 2, kind: input, shape index: {}]   ;;  %s1416_s3 = inlined_call_operand.vmem [shape: bf16[2,4,16], index: 3, kind: input, shape index: {}]   ;;  %s1417_s4 = inlined_call_operand.vmem [shape: bf16[16,6], index: 4, kind: input, shape index: {}]   ;;  %s1418_s5 = inlined_call_operand.vmem [shape: bf16[16,4], index: 5, kind: input, shape index: {}]   ;;  %s1419_s6 = inlined_call_operand.vmem [shape: f32[16,1], index: 6, kind: input, shape index: {}]   ;;  %s1420_s7 = inlined_call_operand.vmem [shape: f32[16,1], index: 7, kind: input, shape index: {}]   ;;  %s1421_s8 = inlined_call_operand.vmem [shape: bf16[32,16], index: 8, kind: input, shape index: {}]   ;;  %s1422_s9 = inlined_call_operand.vmem [shape: f32[32,1], index: 9, kind: input, shape index: {}]   ;;  %s1423_s10 = inlined_call_operand.vmem [shape: f32[32,1], index: 10, kind: input, shape index: {}]   ;;  %s1424_s11 = inlined_call_operand.vmem [shape: f32[2,32,16], index: 11, kind: output, shape index: {}]  }
   0x1   :  { %s1267_s19 = smov 0  }
   0x2 LB: > { %s33_s20 = sadd.s32 1, %s1192_s18  ;;  %p1070_p0 = scmp.ge.s32.totalorder %s1196_s19, 1  ;;  %s1196_s19 = sphi %s1267_s19, %s21_s19   ;;  %s1192_s18 = sphi %s1265_s18, %s1426_s18   ;;  %s1188_s17 = sphi %s1263_s17, %s1425_s17  }
   0x3   : > { %p35_p1 = scmp.ge.s32.totalorder %s33_s20, 2  ;;  %p387_p2 = scmp.lt.s32.totalorder %s1196_s19, 3 }
   0x5   : > { %s1428_s20 = smov (%p35_p1, %s33_s20), 0  ;;  %p388_p3 = pnand %p1070_p0, %p387_p2 }
   0x6   : > { %p447_p4 = scmp.lt.s32.totalorder (!%p388_p3), %s1188_s17, 1 }
   0x7   : > { %391 = sbr.rel (%p388_p3) target bundleno = 903 (0x387), region = 64 }
   0xc   : > { %v1198_v0 = vmov 0   ;;  %v1199_v1 = vmov 2   ;;  %s1430_s17 = smov (!%p447_p4, %s1188_s17), 1  ;;  %v1200_v3 = vmov 1   ;;  %v1201_v4 = vmov 0.0  }
   0xd   : > { %1151 = vset.pattern.permute.xlu0 %v1198_v0  ;;  %1153 = vset.pattern.permute.xlu1 %v1199_v1  ;;  %s1072_s21 = sshll.u32 %s1430_s17, 3  ;;  %v486_v5 = vlaneseq  ;;  %s1071_s25 = sshll.u32 %s1430_s17, 2  ;;  %vm517_vm0 = vcmask 130048   ;;  %vm1202_vm1 = vmmov 0   ;;  %vm688_vm2 = vcmask 1041408  }
   0xe   : > { %s457_s24 = scalar_lea.vmem %s1414_s1, %s1072_s21  ;;  %1098 = vmatprep.subr.bf16.mxu0 %v1201_v4  ;;  %1104 = vmatprep.subr.bf16.mxu1 %v1201_v4  ;;  %s453_s28 = scalar_lea.vmem %s1413_s0, %s1071_s25 }
   0xf   : > { %v479_v2 = vld [vmem:[%s457_s24] sm:$0xff]  ;;  %v1290_v6 = vshrl.u32 %v486_v5, 7  ;;  %1100 = vmatprep.mubr.msk.bf16.mxu0 %vm1202_vm1, %v1201_v4  ;;  %1106 = vmatprep.mubr.msk.bf16.mxu1 %vm1202_vm1, %v1201_v4  ;;  %s1074_s29 = sshll.u32 %s1430_s17, 1  ;;  %s461_s16 = scalar_lea.vmem %s1415_s2, %s1071_s25 }
  0x10   : > { %483 = vperm.xlu0 %1151, %v479_v2   ;;  %505 = vperm.xlu1 %1153, %v479_v2   ;;  %v478_v9 = vld [vmem:[%s453_s28] sm:$0x7]  ;;  %s468_s13 = scalar_lea.vmem %s1416_s3, %s1074_s29  ;;  %s1088_s23 = sshll.u32 %s1430_s17, 5 }
  0x11   : > { %v488_v7 = vsub.s32 0, %v1290_v6  ;;  %v510_v8 = vsub.s32 2, %v1290_v6  ;;  %v499_v10 = vsub.s32 1, %v1290_v6  ;;  %v678_v30 = vld [vmem:[%s468_s13] sm:$0x3]  ;;  %s476_s26 = scalar_lea.vmem %s1424_s11, %s1088_s23 }
  0x12   : > { %v690_v32 = vsel %vm688_vm2, %v678_v30, 0 }
  0x13   : > { %v489_v12 = vrot.slane %v478_v9, %v488_v7  ;;  %v511_v13 = vrot.slane %v478_v9, %v510_v8  ;;  %v500_v15 = vrot.slane %v478_v9, %v499_v10  ;;  %1105 = vmatpush3.bf16.msra.mxu1 %v690_v32 }
  0x14   : > { %1152 = vset.pattern.permute.xlu0 %v1200_v3  ;;  %1154 = vset.pattern.permute.xlu1 %v1198_v0 }
  0x15   : > { %494 = vperm.xlu0 %1152, %v479_v2  }
  0x19   : > { %1155 = vset.pattern.permute.xlu0 %v1198_v0 }
  0x8b   : > { %v484_v11 = vpop.permute.xlu0 %483  ;;  %v506_v14 = vpop.permute.xlu1 %505 }
  0x8c   : > { %v490_v16 = vsub.f32 %v484_v11, %v489_v12  ;;  %v512_v17 = vsub.f32 %v506_v14, %v511_v13 }
  0x8e   : > { %v491_v20 = vmul.f32 %v490_v16, %v490_v16  ;;  %v513_v22 = vmul.f32 %v512_v17, %v512_v17 }
  0x90   : > { %v495_v18 = vpop.permute.xlu0 %494 }
  0x91   : > { %v501_v19 = vsub.f32 %v495_v18, %v500_v15 }
  0x93   : > { %v502_v21 = vmul.f32 %v501_v19, %v501_v19 }
  0x95   : > { %v503_v23 = vadd.f32 %v502_v21, %v491_v20 }
  0x97   : > { %v514_v24 = vadd.f32 %v513_v22, %v503_v23 }
  0x99   : > { %v518_v25 = vsel %vm517_vm0, %v514_v24, inf }
  0x9a   : > { %v519_v26 = vrot.slane %v518_v25, 4 }
  0x9c   : > { %v520_v27 = vmin.f32 %v518_v25, %v519_v26 }
  0x9e   : > { %v521_v28 = vrot.slane %v520_v27, 2 }
  0xa0   : > { %v522_v29 = vmin.f32 %v520_v27, %v521_v28 }
  0xa2   : > { %v523_v31 = vrot.slane %v522_v29, 1 }
  0xa4   : > { %v524_v33 = vmin.f32 %v522_v29, %v523_v31 }
  0xa6   : > { %vm525_vm3 = vcmp.eq.f32.partialorder %v514_v24, %v524_v33  ;;  %vm539_vm14 = vcmp.eq.f32.partialorder %v524_v33, inf  ;;  %v542_v11 = vand.u32 2147483648, %v524_v33  ;;  %vm541_vm2 = vcmp.eq.f32.partialorder %v524_v33, 0.0 }
  0xa7   : > { %v526_v34 = vsel %vm525_vm3, %v1290_v6, 8 }
  0xa8   : > { %v527_v35 = vsel %vm517_vm0, %v526_v34, 2147483647 }
  0xa9   : > { %v528_v36 = vrot.slane %v527_v35, 4 }
  0xab   : > { %vm529_vm4 = vcmp.lt.s32.totalorder %v527_v35, %v528_v36 }
  0xac   : > { %v530_v37 = vsel %vm529_vm4, %v527_v35, %v528_v36 }
  0xad   : > { %v531_v38 = vrot.slane %v530_v37, 2 }
  0xaf   : > { %vm532_vm5 = vcmp.lt.s32.totalorder %v530_v37, %v531_v38 }
  0xb0   : > { %v533_v39 = vsel %vm532_vm5, %v530_v37, %v531_v38 }
  0xb1   : > { %v534_v40 = vrot.slane %v533_v39, 1 }
  0xb3   : > { %vm535_vm6 = vcmp.lt.s32.totalorder %v533_v39, %v534_v40 }
  0xb4   : > { %v1311_v41 = vsel %vm535_vm6, %v533_v39, %v534_v40 }
  0xb5   : > { %vm547_vm7 = vcmp.eq.s32.totalorder %v1290_v6, %v1311_v41  ;;  %v673_v41 = vld [vmem:[%s1419_s6] sm:$0xff] }
  0xb6   : > { %v548_v42 = vsel %vm547_vm7, 3e+38, %v514_v24  ;;  %789 = vperm.xlu1 %1154, %v673_v41  }
  0xb7   : > { %v549_v43 = vsel %vm517_vm0, %v548_v42, inf }
  0xb8   : > { %v550_v44 = vrot.slane %v549_v43, 4 }
  0xba   : > { %v551_v45 = vmin.f32 %v549_v43, %v550_v44 }
  0xbc   : > { %v552_v46 = vrot.slane %v551_v45, 2 }
  0xbe   : > { %v553_v47 = vmin.f32 %v551_v45, %v552_v46  ;;  %v480_v45 = vld [vmem:[%s461_s16] sm:$0x7] }
  0xbf   : > { %v675_v46 = vld [vmem:[%s1420_s7] sm:$0xff] }
  0xc0   : > { %v554_v48 = vrot.slane %v553_v47, 1  ;;  %801 = vperm.xlu0 %1155, %v675_v46  }
  0xc2   : > { %v555_v49 = vmin.f32 %v553_v47, %v554_v48  ;;  %v674_v47 = vld [vmem:[%s1419_s6 + $0x8] sm:$0xff] }
  0xc3   : > { %794 = vperm.xlu1 %1154, %v674_v47   ;;  %v676_v48 = vld [vmem:[%s1420_s7 + $0x8] sm:$0xff] }
  0xc4   : > { %vm556_vm8 = vcmp.eq.f32.partialorder %v548_v42, %v555_v49  ;;  %1160 = vrsqrt.f32 %v555_v49  ;;  %vm570_vm13 = vcmp.eq.f32.partialorder %v555_v49, inf  ;;  %v573_v9 = vand.u32 2147483648, %v555_v49 }
  0xc5   : > { %v557_v50 = vsel %vm556_vm8, %v1290_v6, 8  ;;  %1162 = vrsqrt.f32 %v524_v33  ;;  %vm572_vm15 = vcmp.eq.f32.partialorder %v555_v49, 0.0 }
  0xc6   : > { %v558_v51 = vsel %vm517_vm0, %v557_v50, 2147483647  ;;  %v817_v50 = vld [vmem:[%s1422_s9] sm:$0xff] }
  0xc7   : > { %v559_v52 = vrot.slane %v558_v51, 4  ;;  %806 = vperm.xlu1 %1154, %v676_v48  }
  0xc9   : > { %vm560_vm9 = vcmp.lt.s32.totalorder %v558_v51, %v559_v52 }
  0xca   : > { %v561_v53 = vsel %vm560_vm9, %v558_v51, %v559_v52  ;;  %v822_v51 = vld [vmem:[%s1423_s10 + $0x8] sm:$0xff]  ;;  %v819_v52 = vld [vmem:[%s1422_s9 + $0x10] sm:$0xff] }
  0xcb   : > { %v562_v54 = vrot.slane %v561_v53, 2  ;;  %893 = vperm.xlu1 %1154, %v817_v50  }
  0xcd   : > { %vm563_vm10 = vcmp.lt.s32.totalorder %v561_v53, %v562_v54 }
  0xce   : > { %v564_v55 = vsel %vm563_vm10, %v561_v53, %v562_v54  ;;  %v824_v53 = vld [vmem:[%s1423_s10 + $0x18] sm:$0xff]  ;;  %v821_v54 = vld [vmem:[%s1423_s10] sm:$0xff] }
  0xcf   : > { %v565_v56 = vrot.slane %v564_v55, 1  ;;  %903 = vperm.xlu1 %1154, %v819_v52  }
  0xd1   : > { %vm566_vm11 = vcmp.lt.s32.totalorder %v564_v55, %v565_v56  ;;  %v1161_v2 = vpop.eup %1160 }
  0xd2   : > { %v1321_v57 = vsel %vm566_vm11, %v564_v55, %v565_v56  ;;  %v1163_v3 = vpop.eup %1162  ;;  %v569_v5 = vmul.f32 %v1161_v2, %v555_v49  ;;  %vm625_vm11 = vcmask 1043456   ;;  %v823_v55 = vld [vmem:[%s1423_s10 + $0x10] sm:$0xff] }
  0xd3   : > { %vm578_vm12 = vcmp.eq.s32.totalorder %v1290_v6, %v1321_v57  ;;  %v538_v7 = vmul.f32 %v1163_v3, %v524_v33  ;;  %917 = vperm.xlu1 %1154, %v821_v54   ;;  %v1158_v3 = vld [vmem:[%s1421_s8] sm:$0xff]  }
  0xd4   : > { %v579_v58 = vsel %vm578_vm12, 3e+38, %v548_v42  ;;  %v571_v8 = vsel %vm570_vm13, %v555_v49, %v569_v5  ;;  %vm621_vm13 = vcmask 64512   ;;  %v820_v49 = vld [vmem:[%s1422_s9 + $0x18] sm:$0xff] }
  0xd5   : > { %v580_v59 = vsel %vm517_vm0, %v579_v58, inf  ;;  %v540_v10 = vsel %vm539_vm14, %v524_v33, %v538_v7  ;;  %v574_v12 = vsel %vm572_vm15, %v573_v9, %v571_v8 }
  0xd6   : > { %v581_v60 = vrot.slane %v580_v59, 4  ;;  %v543_v13 = vsel %vm541_vm2, %v542_v11, %v540_v10  ;;  %v575_v14 = vadd.f32 1e-08, %v574_v12 }
  0xd7   : > { %v544_v16 = vadd.f32 1e-08, %v543_v13  ;;  %927 = vperm.xlu1 %1154, %v823_v55  }
  0xd8   : > { %v582_v61 = vmin.f32 %v580_v59, %v581_v60  ;;  %v1157_v60 = vld [vmem:[%s1417_s4] sm:$0xff]  }
  0xda   : > { %v583_v62 = vrot.slane %v582_v61, 2 }
  0xdc   : > { %v584_v63 = vmin.f32 %v582_v61, %v583_v62 }
  0xde   : > { %v585_v0 = vrot.slane %v584_v63, 1 }
  0xe0   : > { %v586_v1 = vmin.f32 %v584_v63, %v585_v0 }
  0xe2   : > { %1164 = vrsqrt.f32 %v586_v1  ;;  %vm587_vm3 = vcmp.eq.f32.partialorder %v579_v58, %v586_v1  ;;  %vm601_vm4 = vcmp.eq.f32.partialorder %v586_v1, inf  ;;  %v604_v19 = vand.u32 2147483648, %v586_v1 }
  0xe3   : > { %v588_v18 = vsel %vm587_vm3, %v1290_v6, 8  ;;  %1166 = vrcp.f32 %v575_v14  ;;  %vm603_vm5 = vcmp.eq.f32.partialorder %v586_v1, 0.0 }
  0xe4   : > { %1168 = vrcp.f32 %v544_v16  ;;  %v589_v22 = vsel %vm517_vm0, %v588_v18, 2147483647 }
  0xe5   : > { %v590_v24 = vrot.slane %v589_v22, 4 }
  0xe7   : > { %vm591_vm6 = vcmp.lt.s32.totalorder %v589_v22, %v590_v24 }
  0xe8   : > { %v592_v25 = vsel %vm591_vm6, %v589_v22, %v590_v24 }
  0xe9   : > { %v593_v28 = vrot.slane %v592_v25, 2 }
  0xeb   : > { %vm594_vm8 = vcmp.lt.s32.totalorder %v592_v25, %v593_v28 }
  0xec   : > { %v595_v32 = vsel %vm594_vm8, %v592_v25, %v593_v28 }
  0xed   : > { %v596_v33 = vrot.slane %v595_v32, 1 }
  0xef   : > { %v1165_v15 = vpop.eup %1164  ;;  %vm597_vm9 = vcmp.lt.s32.totalorder %v595_v32, %v596_v33 }
  0xf0   : > { %v600_v17 = vmul.f32 %v1165_v15, %v586_v1  ;;  %v1167_v26 = vpop.eup %1166  ;;  %v598_v34 = vsel %vm597_vm9, %v595_v32, %v596_v33 }
  0xf1   : > { %v1169_v27 = vpop.eup %1168  ;;  %vm616_vm10 = vcmp.eq.s32.totalorder %v1290_v6, %v598_v34  ;;  %v1156_v6 = vld [vmem:[%s1418_s5] sm:$0xff]  }
  0xf2   : > { %v602_v20 = vsel %vm601_vm4, %v586_v1, %v600_v17  ;;  %v609_v29 = vadd.f32 %v1169_v27, %v1167_v26 }
  0xf3   : > { %v605_v21 = vsel %vm603_vm5, %v604_v19, %v602_v20 }
  0xf4   : > { %v606_v23 = vadd.f32 1e-08, %v605_v21 }
  0xf6   : > { %1170 = vrcp.f32 %v606_v23  ;;  %v1159_v23 = vld [vmem:[%s1421_s8 + $0x8] sm:$0xff]  }
 0x103   : > { %v1171_v30 = vpop.eup %1170 }
 0x104   : > { %v610_v31 = vadd.f32 %v1171_v30, %v609_v29 }
 0x106   : > { %1172 = vrcp.f32 %v610_v31 }
 0x113   : > { %v1173_v35 = vpop.eup %1172 }
 0x114   : > { %v614_v36 = vmul.f32 %v1173_v35, %v1167_v26  ;;  %v615_v37 = vmul.f32 %v1173_v35, %v1171_v30  ;;  %v613_v38 = vmul.f32 %v1173_v35, %v1169_v27 }
 0x116   : > { %v617_v39 = vsel %vm616_vm10, %v615_v37, 0.0 }
 0x117   : > { %v618_v40 = vsel %vm578_vm12, %v614_v36, %v617_v39  ;;  %vm738_vm12 = vcmask 48128  }
 0x118   : > { %v619_v42 = vsel %vm547_vm7, %v613_v38, %v618_v40  ;;  %vm684_vm7 = vcmask 31744  }
 0x119   : > { %v620_v43 = vpack.c.bf16 %v619_v42, %v619_v42  ;;  %1107 = vmatmul.mubr.msk.bf16.vlgmr.msra.gmra.mxu1 %vm684_vm7, %v1156_v6 }
 0x11a   : > { %1118 = vmatprep.mubr.msk.bf16.mxu1 %vm517_vm0, %v1158_v3 }
 0x11b   : > { %v627_v44 = vsel %vm625_vm11, %v620_v43, 0 }
 0x11c   : > { %1099 = vmatpush3.bf16.msra.mxu0 %v627_v44 }
 0x11d   : > { %1110 = vmatprep.subr.bf16.mxu0 %v1201_v4 }
 0x11f   : > { %1101 = vmatmul.mubr.msk.bf16.vlgmr.msra.gmra.mxu0 %vm621_vm13, %v480_v45 }
 0x120   : > { %1112 = vmatprep.mubr.msk.bf16.mxu0 %vm1202_vm1, %v1201_v4  ;;  %v818_v4 = vld [vmem:[%s1422_s9 + $0x8] sm:$0xff]  ;;  %vm742_vm1 = vcmask 1042432  }
 0x121   : > { %898 = vperm.xlu0 %1155, %v818_v4  }
 0x125   : > { %908 = vperm.xlu0 %1155, %v820_v49  }
 0x129   : > { %922 = vperm.xlu0 %1155, %v822_v51  }
 0x12d   : > { %932 = vperm.xlu0 %1155, %v824_v53  }
 0x131   : > { %v790_v5 = vpop.permute.xlu1 %789 }
 0x13b   : > { %v802_v14 = vpop.permute.xlu0 %801 }
 0x13e   : > { %v795_v9 = vpop.permute.xlu1 %794 }
 0x142   : > { %v807_v18 = vpop.permute.xlu1 %806 }
 0x146   : > { %v894_v24 = vpop.permute.xlu1 %893 }
 0x14a   : > { %v904_v26 = vpop.permute.xlu1 %903 }
 0x14e   : > { %v918_v28 = vpop.permute.xlu1 %917 }
 0x152   : > { %v928_v32 = vpop.permute.xlu1 %927 }
 0x19c   : > { %v899_v25 = vpop.permute.xlu0 %898 }
 0x1a0   : > { %v909_v27 = vpop.permute.xlu0 %908 }
 0x1a4   : > { %v923_v29 = vpop.permute.xlu0 %922 }
 0x1a8   : > { %v933_v40 = vpop.permute.xlu0 %932 }
 0x1d9   : > { %v726_v63 = vpop.f32.mrf.mxu1 }
 0x1db   : > { %v1108_v0 = vpop.f32.mrf.mxu1 }
 0x1dd   : > { %v729_v1 = vpop.f32.mrf.mxu1 }
 0x1df   : > { %v663_v56 = vpop.f32.mrf.mxu0  ;;  %v1109_v2 = vpop.f32.mrf.mxu1 }
 0x1e0   : > { %v677_v57 = vpack.c.bf16 %v663_v56, %v663_v56 }
 0x1e1   : > { %v1102_v58 = vpop.f32.mrf.mxu0 }
 0x1e2   : > { %v744_v59 = vsel %vm742_vm1, %v677_v57, 0 }
 0x1e3   : > { %v666_v61 = vpop.f32.mrf.mxu0  ;;  %1111 = vmatpush3.bf16.msra.mxu0 %v744_v59 }
 0x1e5   : > { %v1103_v62 = vpop.f32.mrf.mxu0 }
 0x1e6   : > { %1113 = vmatmul.mubr.msk.bf16.vlgmr.msra.gmra.mxu0 %vm738_vm12, %v1157_v60 }
 0x2a6   : > { %v780_v7 = vpop.f32.mrf.mxu0 }
 0x2a7   : > { %v781_v8 = vadd.f32 %v780_v7, %v726_v63 }
 0x2a8   : > { %v1114_v10 = vpop.f32.mrf.mxu0 }
 0x2a9   : > { %v797_v11 = vmul.f32 %v790_v5, %v781_v8 }
 0x2aa   : > { %v783_v12 = vpop.f32.mrf.mxu0 }
 0x2ab   : > { %v784_v13 = vadd.f32 %v783_v12, %v729_v1  ;;  %v809_v16 = vadd.f32 %v802_v14, %v797_v11 }
 0x2ac   : > { %v1115_v15 = vpop.f32.mrf.mxu0 }
 0x2ad   : > { %v798_v17 = vmul.f32 %v795_v9, %v784_v13  ;;  %v811_v20 = vmax.f32 %v809_v16, 0.0 }
 0x2af   : > { %v810_v19 = vadd.f32 %v807_v18, %v798_v17 }
 0x2b1   : > { %v812_v21 = vmax.f32 %v810_v19, 0.0 }
 0x2b3   : > { %v825_v22 = vpack.c.bf16 %v812_v21, %v811_v20 }
 0x2b5   : > { %1116 = vmatprep.subr.bf16.mxu1 %v825_v22 }
 0x2b6   : > { %1117 = vmatpush3.bf16.msra.mxu1 %v825_v22 }
 0x2b9   : > { %1119 = vmatmul.mubr.msk.bf16.vlgmr.msra.gmra.mxu1 %vm517_vm0, %v1159_v23 }
 0x379   : > { %v1120_v30 = vpop.f32.mrf.mxu1 }
 0x37a   : > { %v913_v31 = vmul.f32 %v1120_v30, %v904_v26 }
 0x37b   : > { %v876_v33 = vpop.f32.mrf.mxu1 }
 0x37c   : > { %v937_v34 = vadd.f32 %v928_v32, %v913_v31  ;;  %v911_v35 = vmul.f32 %v894_v24, %v876_v33 }
 0x37d   : > { %v1121_v36 = vpop.f32.mrf.mxu1 }
 0x37e   : > { %v941_v37 = vmax.f32 %v937_v34, 0.0  ;;  %v935_v38 = vadd.f32 %v918_v28, %v911_v35  ;;  %v914_v39 = vmul.f32 %v1121_v36, %v909_v27 }
 0x37f   : > { %v879_v42 = vpop.f32.mrf.mxu1 }
 0x380   : > { %945 = vst.msk [vmem:[%s476_s26 + $0x10] sm:$0xff] %vm517_vm0, %v941_v37  ;;  %v939_v43 = vmax.f32 %v935_v38, 0.0  ;;  %v938_v44 = vadd.f32 %v933_v40, %v914_v39  ;;  %v912_v45 = vmul.f32 %v899_v25, %v879_v42 }
 0x382   : > { %943 = vst.msk [vmem:[%s476_s26] sm:$0xff] %vm517_vm0, %v939_v43  ;;  %v942_v6 = vmax.f32 %v938_v44, 0.0  ;;  %v936_v41 = vadd.f32 %v923_v29, %v912_v45 }
 0x384   : > { %946 = vst.msk [vmem:[%s476_s26 + $0x18] sm:$0xff] %vm517_vm0, %v942_v6  ;;  %v940_v46 = vmax.f32 %v936_v41, 0.0 }
 0x386   : > { %944 = vst.msk [vmem:[%s476_s26 + $0x8] sm:$0xff] %vm517_vm0, %v940_v46 }
 0x387 PF: > { %s21_s19 = sadd.s32 1, %s1196_s19   ;;  %s1425_s17 = smov %s1192_s18 }
 0x388   : > { %p18_p5 = scmp.ge.s32.totalorder %s21_s19, 4   ;;  %s1426_s18 = smov %s1428_s20 }
 0x38a   :  { %20 = sbr.rel (!%p18_p5) target bundleno = 2 (0x2), region = 103 }

</bundles_post_ra>
